<compile_context>
chip_gen: v5e
topology: v5e:2x2
jax: 0.10.0
libtpu: 0.0.40
codegen_flags: <defaults>
</compile_context>

<pallas_src>
import math
import jax
import jax.numpy as jnp
from jax.experimental import pallas as pl
from jax.experimental.pallas import tpu as pltpu

# ---------------- small deterministic config ----------------
VOCAB = 16
HDIM = 32
N_HEAD = 4
HEAD = HDIM // N_HEAD          # config.head_size
MAX_OUTPUT_LEN = 4
MAX_LATENT = 4
INPUT_CACHE = 16
MEM_CACHE = 8
LN_EPS = 1e-5

# fused tail-projection layout (lane-dense 128-wide slab)
TAIL = 128
C_PROBE = 0
C_OPROBE = 1
C_LOGITS = 2
C_KV = C_LOGITS + VOCAB        # 18 .. 18 + 2*HDIM = 82


def _new_gelu(x):
    return 0.5 * x * (1.0 + jnp.tanh(math.sqrt(2.0 / math.pi) * (x + 0.044715 * x ** 3)))


def _layernorm(x, g, b):
    mu = jnp.mean(x, axis=-1, keepdims=True)
    var = jnp.mean((x - mu) ** 2, axis=-1, keepdims=True)
    return (x - mu) * jax.lax.rsqrt(var + LN_EPS) * g + b


# ---------------- Pallas kernel: one compute_step per batch block ----------------
def _make_kernel(bb, L, T, w1, H, n_head, head):
    """One grid step processes `bb` batch elements, fully resident in VMEM."""
    S_q = L + w1
    scale = 1.0 / math.sqrt(head)
    dnums = (((1,), (1,)), ((), ()))   # contract last dims, no batch dims

    def kernel(lat_ref, kin_ref, vin_ref, qout_ref,
               ln1g_ref, ln1b_ref, wsc_ref, bsc_ref,
               wfc_ref, bfc_ref, wpj_ref, bpj_ref,
               ln2g_ref, ln2b_ref, wtail_ref, btail_ref,
               slab_ref, newlat_ref):

        def mlpf(t):
            h = jnp.dot(t, wfc_ref[...], preferred_element_type=jnp.float32) + bfc_ref[...]
            return jnp.dot(_new_gelu(h), wpj_ref[...],
                           preferred_element_type=jnp.float32) + bpj_ref[...]

        # ln_1 over all latent rows of the batch block at once: (bb*L, H)
        lat_ln = _layernorm(lat_ref[...], ln1g_ref[...], ln1b_ref[...])
        qout = qout_ref[...]

        # add_latent: x rows of batch element b = [ln_1(latent_b) ; query_output]
        pieces = []
        for b in range(bb):
            pieces.append(lat_ln[b * L:(b + 1) * L, :])
            pieces.append(qout)
        x = jnp.concatenate(pieces, axis=0) if len(pieces) > 1 else pieces[0]   # (bb*S_q, H)

        # attn_sc projection for the whole batch block: one (bb*S_q, H) x (H, 3H) matmul
        qkv = jnp.dot(x, wsc_ref[...], preferred_element_type=jnp.float32) + bsc_ref[...]

        kin = kin_ref[...]
        vin = vin_ref[...]

        # Multi-head SDPA, keys = [input-cache kv ; self kv], no mask
        # (causal_mask_len is None for integer with_output).  Two-piece softmax
        # avoids materializing the concatenated K/V.
        # TODO(synk): heads handled by a small unrolled loop; a head-batched
        # dot_general would need an in-kernel (S,H)->(heads,S,head) relayout that is
        # not worthwhile at these tiny sub-(8,128) sizes.
        batch_rows = []
        for b in range(bb):
            rq = slice(b * S_q, (b + 1) * S_q)
            rk = slice(b * T, (b + 1) * T)
            heads = []
            for h in range(n_head):
                cs = slice(h * head, (h + 1) * head)
                qh = qkv[rq, cs]
                knh = qkv[rq, H + h * head:H + (h + 1) * head]
                vnh = qkv[rq, 2 * H + h * head:2 * H + (h + 1) * head]
                kih = kin[rk, cs]
                vih = vin[rk, cs]
                s1 = jax.lax.dot_general(qh, kih, dnums,
                                         preferred_element_type=jnp.float32) * scale
                s2 = jax.lax.dot_general(qh, knh, dnums,
                                         preferred_element_type=jnp.float32) * scale
                m = jnp.maximum(jnp.max(s1, axis=-1, keepdims=True),
                                jnp.max(s2, axis=-1, keepdims=True))
                p1 = jnp.exp(s1 - m)
                p2 = jnp.exp(s2 - m)
                inv = pl.reciprocal(jnp.sum(p1, axis=-1, keepdims=True)
                                    + jnp.sum(p2, axis=-1, keepdims=True), approx=True)
                o = (jnp.dot(p1, vih, preferred_element_type=jnp.float32)
                     + jnp.dot(p2, vnh, preferred_element_type=jnp.float32)) * inv
                heads.append(o)
            batch_rows.append(jnp.concatenate(heads, axis=-1))
        attn = jnp.concatenate(batch_rows, axis=0) if bb > 1 else batch_rows[0]

        attn = mlpf(attn)
        y = x + mlpf(_layernorm(attn, ln2g_ref[...], ln2b_ref[...]))    # (bb*S_q, H)

        # Fused tail: probe | output_probe | output_proj | attn_kv_memory in a single
        # lane-dense (bb*S_q, 128) matmul + full-width store.
        slab_ref[...] = jnp.dot(y, wtail_ref[...],
                                preferred_element_type=jnp.float32) + btail_ref[...]

        # Exact new latent (first L residual rows of each batch element).
        nl = [y[b * S_q:b * S_q + L, :] for b in range(bb)]
        newlat_ref[...] = jnp.concatenate(nl, axis=0) if bb > 1 else nl[0]

    return kernel


def _pick_batch_block(B, L, T, S_q):
    if B <= 8:
        return B                      # block == full array, always legal
    for d in range(8, 0, -1):
        if B % d == 0 and (d * L) % 8 == 0 and (d * T) % 8 == 0 and (d * S_q) % 8 == 0:
            return d
    return B


# ---------------- wrapper ----------------
def thinker_step(latent0, k_in, v_in, qout, params):
    B, L, H = latent0.shape
    T = k_in.shape[1]
    w1 = qout.shape[0]                # = with_output + 1
    S_q = L + w1
    V = params['w_out'].shape[1]
    assert C_KV + 2 * H <= TAIL

    # Fuse the four tail projections into one lane-dense (H, 128) weight / bias.
    w_tail = jnp.zeros((H, TAIL), jnp.float32)
    w_tail = w_tail.at[:, C_PROBE:C_PROBE + 1].set(params['w_probe'])
    w_tail = w_tail.at[:, C_OPROBE:C_OPROBE + 1].set(params['w_oprobe'])
    w_tail = w_tail.at[:, C_LOGITS:C_LOGITS + V].set(params['w_out'])
    w_tail = w_tail.at[:, C_KV:C_KV + 2 * H].set(params['w_kv_mem'])
    b_tail = jnp.zeros((1, TAIL), jnp.float32)
    b_tail = b_tail.at[:, C_PROBE:C_PROBE + 1].set(params['b_probe'])
    b_tail = b_tail.at[:, C_OPROBE:C_OPROBE + 1].set(params['b_oprobe'])
    b_tail = b_tail.at[:, C_LOGITS:C_LOGITS + V].set(params['b_out'])
    b_tail = b_tail.at[:, C_KV:C_KV + 2 * H].set(params['b_kv_mem'])

    weights = [params['ln1_g'], params['ln1_b'], params['w_sc'], params['b_sc'],
               params['w_fc'], params['b_fc'], params['w_proj'], params['b_proj'],
               params['ln2_g'], params['ln2_b'], w_tail, b_tail]

    bb = _pick_batch_block(B, L, T, S_q)
    n_blk = B // bb

    # Flatten batch x seq onto the sublane axis (free XLA reshapes in the wrapper).
    lat_flat = latent0.reshape(B * L, H)
    kin_flat = k_in.reshape(B * T, H)
    vin_flat = v_in.reshape(B * T, H)

    def shared(a):
        return pl.BlockSpec(a.shape, lambda i: (0,) * a.ndim)

    in_specs = [
        pl.BlockSpec((bb * L, H), lambda i: (i, 0)),       # latent rows
        pl.BlockSpec((bb * T, H), lambda i: (i, 0)),       # k from input cache
        pl.BlockSpec((bb * T, H), lambda i: (i, 0)),       # v from input cache
        shared(qout),                                      # query_output rows
    ] + [shared(a) for a in weights]

    out_shape = (
        jax.ShapeDtypeStruct((B * S_q, TAIL), jnp.float32),   # fused projection slab
        jax.ShapeDtypeStruct((B * L, H), jnp.float32),        # new latent
    )
    out_specs = (
        pl.BlockSpec((bb * S_q, TAIL), lambda i: (i, 0)),
        pl.BlockSpec((bb * L, H), lambda i: (i, 0)),
    )

    fn = pl.pallas_call(
        _make_kernel(bb, L, T, w1, H, N_HEAD, HEAD),
        grid=(n_blk,),
        in_specs=in_specs,
        out_specs=out_specs,
        out_shape=out_shape,
        compiler_params=pltpu.CompilerParams(dimension_semantics=("parallel",)),
    )
    slab, newlat = fn(lat_flat, kin_flat, vin_flat, qout, *weights)

    slab = slab.reshape(B, S_q, TAIL)
    probe = slab[:, L, C_PROBE:C_PROBE + 1]                              # (B, 1)
    logits = slab[:, L + 1:, C_LOGITS:C_LOGITS + V]                      # (B, w, V)
    outputs_probe = jnp.squeeze(slab[:, L + 1:, C_OPROBE:C_OPROBE + 1])  # torch .squeeze()
    kmem = slab[:, :L, C_KV:C_KV + H]
    vmem = slab[:, :L, C_KV + H:C_KV + 2 * H]
    new_lat = newlat.reshape(B, L, H)
    return probe, logits, outputs_probe, new_lat, kmem, vmem


# ---------------- plain-JAX glue: params, positional encoding, load_input ----------------
def init_params(key):
    ks = jax.random.split(key, 12)
    std = 0.02

    def lin(k, i, o):
        return std * jax.random.normal(k, (i, o), jnp.float32)

    p = {}
    p['input_emb'] = std * jax.random.normal(ks[0], (VOCAB, HDIM), jnp.float32)
    p['query_output'] = std * jax.random.normal(ks[1], (MAX_OUTPUT_LEN + 1, HDIM), jnp.float32)
    p['trained_latent'] = std * jax.random.normal(ks[2], (MAX_LATENT, HDIM), jnp.float32)
    p['w_kv_in'] = lin(ks[3], HDIM, 2 * HDIM); p['b_kv_in'] = jnp.zeros((1, 2 * HDIM), jnp.float32)
    p['w_kv_mem'] = lin(ks[4], HDIM, 2 * HDIM); p['b_kv_mem'] = jnp.zeros((1, 2 * HDIM), jnp.float32)
    p['w_sc'] = lin(ks[5], HDIM, 3 * HDIM); p['b_sc'] = jnp.zeros((1, 3 * HDIM), jnp.float32)
    p['ln1_g'] = jnp.ones((1, HDIM), jnp.float32); p['ln1_b'] = jnp.zeros((1, HDIM), jnp.float32)
    p['ln2_g'] = jnp.ones((1, HDIM), jnp.float32); p['ln2_b'] = jnp.zeros((1, HDIM), jnp.float32)
    p['w_fc'] = lin(ks[6], HDIM, 4 * HDIM); p['b_fc'] = jnp.zeros((1, 4 * HDIM), jnp.float32)
    p['w_proj'] = lin(ks[7], 4 * HDIM, HDIM); p['b_proj'] = jnp.zeros((1, HDIM), jnp.float32)
    p['w_probe'] = lin(ks[8], HDIM, 1); p['b_probe'] = jnp.zeros((1, 1), jnp.float32)
    p['w_oprobe'] = lin(ks[9], HDIM, 1); p['b_oprobe'] = jnp.zeros((1, 1), jnp.float32)
    p['w_out'] = lin(ks[10], HDIM, VOCAB); p['b_out'] = jnp.zeros((1, VOCAB), jnp.float32)
    return p


def positional_encoding(d_model, max_len):
    position = jnp.arange(max_len, dtype=jnp.float32)[:, None]
    div_term = jnp.exp(jnp.arange(0, d_model, 2, dtype=jnp.float32)
                       * (-math.log(max_len * 2) / d_model))
    pe = jnp.zeros((max_len, d_model), jnp.float32)
    pe = pe.at[:, 0::2].set(jnp.sin(position * div_term))
    pe = pe.at[:, 1::2].set(jnp.cos(position * div_term))
    return pe


def load_input(tokens, params, pe):
    x = params['input_emb'][tokens]                 # (B, T, H)
    x = x + pe[:x.shape[1]][None]
    kv = jnp.einsum('bth,hd->btd', x, params['w_kv_in']) + params['b_kv_in'][None]
    return kv[..., :HDIM], kv[..., HDIM:]           # k_in, v_in written to the input cache


# ---------------- pure-JAX reference of compute_step (for validation) ----------------
def thinker_step_ref(latent0, k_in, v_in, qout, params):
    B, L, H = latent0.shape
    lat_ln = _layernorm(latent0, params['ln1_g'][0], params['ln1_b'][0])
    x = jnp.concatenate([lat_ln, jnp.broadcast_to(qout[None], (B,) + qout.shape)], axis=1)
    qkv = jnp.einsum('bsh,hd->bsd', x, params['w_sc']) + params['b_sc'][None]
    q, k_new, v_new = jnp.split(qkv, 3, axis=-1)
    k = jnp.concatenate([k_in, k_new], axis=1)
    v = jnp.concatenate([v_in, v_new], axis=1)

    def split_heads(t):
        return t.reshape(B, t.shape[1], N_HEAD, HEAD).transpose(0, 2, 1, 3)

    qh, kh, vh = split_heads(q), split_heads(k), split_heads(v)
    s = jnp.einsum('bhqd,bhkd->bhqk', qh, kh) / math.sqrt(HEAD)
    p = jax.nn.softmax(s, axis=-1)
    o = jnp.einsum('bhqk,bhkd->bhqd', p, vh).transpose(0, 2, 1, 3).reshape(B, -1, H)

    def mlpf(t):
        hmid = _new_gelu(jnp.einsum('bsh,hd->bsd', t, params['w_fc']) + params['b_fc'][None])
        return jnp.einsum('bsd,dh->bsh', hmid, params['w_proj']) + params['b_proj'][None]

    o = mlpf(o)
    x = x + mlpf(_layernorm(o, params['ln2_g'][0], params['ln2_b'][0]))
    new_lat = x[:, :L]
    out_lat = x[:, L:]
    probe = out_lat[:, 0, :] @ params['w_probe'] + params['b_probe'][0]
    rest = out_lat[:, 1:, :]
    oprobe = jnp.squeeze(jnp.einsum('bsh,ho->bso', rest, params['w_oprobe'])
                         + params['b_oprobe'][None])
    logits = jnp.einsum('bsh,hv->bsv', rest, params['w_out']) + params['b_out'][None]
    kvm = jnp.einsum('bsh,hd->bsd', new_lat, params['w_kv_mem']) + params['b_kv_mem'][None]
    return probe, logits, oprobe, new_lat, kvm[..., :HDIM], kvm[..., HDIM:]


if __name__ == "__main__":
    key = jax.random.PRNGKey(0)
    kp, kt = jax.random.split(key)
    params = init_params(kp)

    B, T, L = 2, 8, MAX_LATENT
    with_output = 3  # int -> query_output rows [0..with_output], no causal mask

    pe = positional_encoding(HDIM, INPUT_CACHE)
    tokens = jax.random.randint(kt, (B, T), 0, VOCAB)
    k_in, v_in = load_input(tokens, params, pe)                        # input cache contents
    latent0 = jnp.tile(params['trained_latent'][None, :L], (B, 1, 1))  # init_latent
    qout = params['query_output'][:with_output + 1]

    outs = thinker_step(latent0, k_in, v_in, qout, params)
    outs = jax.block_until_ready(outs)

    refs = thinker_step_ref(latent0, k_in, v_in, qout, params)
    for got, want in zip(outs, refs):
        assert got.shape == want.shape, (got.shape, want.shape)
        assert jnp.allclose(got, want, rtol=2e-3, atol=2e-3), \
            float(jnp.max(jnp.abs(got - want)))

    print("KERNEL_OK")
</pallas_src>

<mosaic_0001>
module attributes {stable_mosaic.version = 11 : i64} {
  func.func @kernel(%arg0: i32, %arg1: memref<8x32xf32, #tpu.memory_space<vmem>>, %arg2: memref<16x32xf32, #tpu.memory_space<vmem>>, %arg3: memref<16x32xf32, #tpu.memory_space<vmem>>, %arg4: memref<4x32xf32, #tpu.memory_space<vmem>>, %arg5: memref<1x32xf32, #tpu.memory_space<vmem>>, %arg6: memref<1x32xf32, #tpu.memory_space<vmem>>, %arg7: memref<32x96xf32, #tpu.memory_space<vmem>>, %arg8: memref<1x96xf32, #tpu.memory_space<vmem>>, %arg9: memref<32x128xf32, #tpu.memory_space<vmem>>, %arg10: memref<1x128xf32, #tpu.memory_space<vmem>>, %arg11: memref<128x32xf32, #tpu.memory_space<vmem>>, %arg12: memref<1x32xf32, #tpu.memory_space<vmem>>, %arg13: memref<1x32xf32, #tpu.memory_space<vmem>>, %arg14: memref<1x32xf32, #tpu.memory_space<vmem>>, %arg15: memref<32x128xf32, #tpu.memory_space<vmem>>, %arg16: memref<1x128xf32, #tpu.memory_space<vmem>>, %arg17: memref<16x128xf32, #tpu.memory_space<vmem>>, %arg18: memref<8x32xf32, #tpu.memory_space<vmem>>) attributes {dimension_semantics = [#tpu.dimension_semantics<parallel>], iteration_bounds = array<i64: 1>, scalar_prefetch = 0 : i64, scratch_operands = 0 : i64, tpu.core_type = #tpu.core_type<tc>, window_params = [{transform_indices = @transform_0, window_bounds = array<i64: 8, 32>}, {transform_indices = @transform_1, window_bounds = array<i64: 16, 32>}, {transform_indices = @transform_2, window_bounds = array<i64: 16, 32>}, {pipeline_mode = #tpu.pipeline_mode<synchronous>, transform_indices = @transform_3, window_bounds = array<i64: 4, 32>}, {pipeline_mode = #tpu.pipeline_mode<synchronous>, transform_indices = @transform_4, window_bounds = array<i64: 1, 32>}, {pipeline_mode = #tpu.pipeline_mode<synchronous>, transform_indices = @transform_5, window_bounds = array<i64: 1, 32>}, {pipeline_mode = #tpu.pipeline_mode<synchronous>, transform_indices = @transform_6, window_bounds = array<i64: 32, 96>}, {pipeline_mode = #tpu.pipeline_mode<synchronous>, transform_indices = @transform_7, window_bounds = array<i64: 1, 96>}, {pipeline_mode = #tpu.pipeline_mode<synchronous>, transform_indices = @transform_8, window_bounds = array<i64: 32, 128>}, {pipeline_mode = #tpu.pipeline_mode<synchronous>, transform_indices = @transform_9, window_bounds = array<i64: 1, 128>}, {pipeline_mode = #tpu.pipeline_mode<synchronous>, transform_indices = @transform_10, window_bounds = array<i64: 128, 32>}, {pipeline_mode = #tpu.pipeline_mode<synchronous>, transform_indices = @transform_11, window_bounds = array<i64: 1, 32>}, {pipeline_mode = #tpu.pipeline_mode<synchronous>, transform_indices = @transform_12, window_bounds = array<i64: 1, 32>}, {pipeline_mode = #tpu.pipeline_mode<synchronous>, transform_indices = @transform_13, window_bounds = array<i64: 1, 32>}, {pipeline_mode = #tpu.pipeline_mode<synchronous>, transform_indices = @transform_14, window_bounds = array<i64: 32, 128>}, {pipeline_mode = #tpu.pipeline_mode<synchronous>, transform_indices = @transform_15, window_bounds = array<i64: 1, 128>}, {transform_indices = @transform_16, window_bounds = array<i64: 16, 128>}, {transform_indices = @transform_17, window_bounds = array<i64: 8, 32>}]} {
    %c0 = arith.constant 0 : index
    %c0_0 = arith.constant 0 : index
    %0 = vector.load %arg1[%c0, %c0_0] : memref<8x32xf32, #tpu.memory_space<vmem>>, vector<8x32xf32>
    %c0_1 = arith.constant 0 : index
    %c0_2 = arith.constant 0 : index
    %1 = vector.load %arg5[%c0_1, %c0_2] : memref<1x32xf32, #tpu.memory_space<vmem>>, vector<1x32xf32>
    %c0_3 = arith.constant 0 : index
    %c0_4 = arith.constant 0 : index
    %2 = vector.load %arg6[%c0_3, %c0_4] : memref<1x32xf32, #tpu.memory_space<vmem>>, vector<1x32xf32>
    %cst = arith.constant dense<0.000000e+00> : vector<8xf32>
    %3 = vector.multi_reduction <add>, %0, %cst [1] : vector<8x32xf32> to vector<8xf32>
    %4 = vector.shape_cast %3 : vector<8xf32> to vector<8x1xf32>
    %cst_5 = arith.constant 3.200000e+01 : f32
    %5 = vector.broadcast %cst_5 : f32 to vector<8x1xf32>
    %6 = arith.divf %4, %5 : vector<8x1xf32>
    %7 = vector.broadcast %6 : vector<8x1xf32> to vector<8x32xf32>
    %8 = arith.subf %0, %7 : vector<8x32xf32>
    %9 = arith.mulf %8, %8 : vector<8x32xf32>
    %cst_6 = arith.constant dense<0.000000e+00> : vector<8xf32>
    %10 = vector.multi_reduction <add>, %9, %cst_6 [1] : vector<8x32xf32> to vector<8xf32>
    %11 = vector.shape_cast %10 : vector<8xf32> to vector<8x1xf32>
    %cst_7 = arith.constant 3.200000e+01 : f32
    %12 = vector.broadcast %cst_7 : f32 to vector<8x1xf32>
    %13 = arith.divf %11, %12 : vector<8x1xf32>
    %14 = vector.broadcast %6 : vector<8x1xf32> to vector<8x32xf32>
    %15 = arith.subf %0, %14 : vector<8x32xf32>
    %cst_8 = arith.constant 9.99999974E-6 : f32
    %16 = vector.broadcast %cst_8 : f32 to vector<8x1xf32>
    %17 = arith.addf %13, %16 : vector<8x1xf32>
    %18 = math.rsqrt %17 : vector<8x1xf32>
    %19 = vector.broadcast %18 : vector<8x1xf32> to vector<8x32xf32>
    %20 = arith.mulf %15, %19 : vector<8x32xf32>
    %21 = vector.broadcast %1 : vector<1x32xf32> to vector<8x32xf32>
    %22 = arith.mulf %20, %21 : vector<8x32xf32>
    %23 = vector.broadcast %2 : vector<1x32xf32> to vector<8x32xf32>
    %24 = arith.addf %22, %23 : vector<8x32xf32>
    %c0_9 = arith.constant 0 : index
    %c0_10 = arith.constant 0 : index
    %25 = vector.load %arg4[%c0_9, %c0_10] : memref<4x32xf32, #tpu.memory_space<vmem>>, vector<4x32xf32>
    %26 = vector.extract_strided_slice %24 {offsets = [0, 0], sizes = [4, 32], strides = [1, 1]} : vector<8x32xf32> to vector<4x32xf32>
    %27 = vector.extract_strided_slice %24 {offsets = [4, 0], sizes = [4, 32], strides = [1, 1]} : vector<8x32xf32> to vector<4x32xf32>
    %28 = tpu.concatenate %26, %25, %27, %25 in 0 : vector<4x32xf32>, vector<4x32xf32>, vector<4x32xf32>, vector<4x32xf32> -> vector<16x32xf32>
    %c0_11 = arith.constant 0 : index
    %c0_12 = arith.constant 0 : index
    %29 = vector.load %arg7[%c0_11, %c0_12] : memref<32x96xf32, #tpu.memory_space<vmem>>, vector<32x96xf32>
    %cst_13 = arith.constant dense<0.000000e+00> : vector<16x96xf32>
    %30 = tpu.matmul %28, %29, %cst_13 {dimension_numbers = #tpu.dot_dimension_numbers<[1], [0], [0], [1], [0, 0, 1, 1], [], []>} : vector<16x32xf32>, vector<32x96xf32>, vector<16x96xf32> -> vector<16x96xf32>
    %c0_14 = arith.constant 0 : index
    %c0_15 = arith.constant 0 : index
    %31 = vector.load %arg8[%c0_14, %c0_15] : memref<1x96xf32, #tpu.memory_space<vmem>>, vector<1x96xf32>
    %32 = vector.broadcast %31 : vector<1x96xf32> to vector<16x96xf32>
    %33 = arith.addf %30, %32 : vector<16x96xf32>
    %c0_16 = arith.constant 0 : index
    %c0_17 = arith.constant 0 : index
    %34 = vector.load %arg2[%c0_16, %c0_17] : memref<16x32xf32, #tpu.memory_space<vmem>>, vector<16x32xf32>
    %c0_18 = arith.constant 0 : index
    %c0_19 = arith.constant 0 : index
    %35 = vector.load %arg3[%c0_18, %c0_19] : memref<16x32xf32, #tpu.memory_space<vmem>>, vector<16x32xf32>
    %36 = vector.extract_strided_slice %33 {offsets = [0, 0], sizes = [8, 8], strides = [1, 1]} : vector<16x96xf32> to vector<8x8xf32>
    %37 = vector.extract_strided_slice %33 {offsets = [0, 32], sizes = [8, 8], strides = [1, 1]} : vector<16x96xf32> to vector<8x8xf32>
    %38 = vector.extract_strided_slice %33 {offsets = [0, 64], sizes = [8, 8], strides = [1, 1]} : vector<16x96xf32> to vector<8x8xf32>
    %39 = vector.extract_strided_slice %34 {offsets = [0, 0], sizes = [8, 8], strides = [1, 1]} : vector<16x32xf32> to vector<8x8xf32>
    %40 = vector.extract_strided_slice %35 {offsets = [0, 0], sizes = [8, 8], strides = [1, 1]} : vector<16x32xf32> to vector<8x8xf32>
    %cst_20 = arith.constant dense<0.000000e+00> : vector<8x8xf32>
    %41 = tpu.matmul %36, %39, %cst_20 {dimension_numbers = #tpu.dot_dimension_numbers<[1], [1], [0], [0], [0, 0, 1, 0], [], []>} : vector<8x8xf32>, vector<8x8xf32>, vector<8x8xf32> -> vector<8x8xf32>
    %cst_21 = arith.constant 0.353553385 : f32
    %42 = vector.broadcast %cst_21 : f32 to vector<8x8xf32>
    %43 = arith.mulf %41, %42 : vector<8x8xf32>
    %cst_22 = arith.constant dense<0.000000e+00> : vector<8x8xf32>
    %44 = tpu.matmul %36, %37, %cst_22 {dimension_numbers = #tpu.dot_dimension_numbers<[1], [1], [0], [0], [0, 0, 1, 0], [], []>} : vector<8x8xf32>, vector<8x8xf32>, vector<8x8xf32> -> vector<8x8xf32>
    %cst_23 = arith.constant 0.353553385 : f32
    %45 = vector.broadcast %cst_23 : f32 to vector<8x8xf32>
    %46 = arith.mulf %44, %45 : vector<8x8xf32>
    %cst_24 = arith.constant dense<0xFF800000> : vector<8xf32>
    %47 = vector.multi_reduction <maximumf>, %43, %cst_24 [1] : vector<8x8xf32> to vector<8xf32>
    %48 = vector.shape_cast %47 : vector<8xf32> to vector<8x1xf32>
    %cst_25 = arith.constant dense<0xFF800000> : vector<8xf32>
    %49 = vector.multi_reduction <maximumf>, %46, %cst_25 [1] : vector<8x8xf32> to vector<8xf32>
    %50 = vector.shape_cast %49 : vector<8xf32> to vector<8x1xf32>
    %51 = arith.maximumf %48, %50 : vector<8x1xf32>
    %52 = vector.broadcast %51 : vector<8x1xf32> to vector<8x8xf32>
    %53 = arith.subf %43, %52 : vector<8x8xf32>
    %54 = math.exp %53 : vector<8x8xf32>
    %55 = vector.broadcast %51 : vector<8x1xf32> to vector<8x8xf32>
    %56 = arith.subf %46, %55 : vector<8x8xf32>
    %57 = math.exp %56 : vector<8x8xf32>
    %cst_26 = arith.constant dense<0.000000e+00> : vector<8xf32>
    %58 = vector.multi_reduction <add>, %54, %cst_26 [1] : vector<8x8xf32> to vector<8xf32>
    %59 = vector.shape_cast %58 : vector<8xf32> to vector<8x1xf32>
    %cst_27 = arith.constant dense<0.000000e+00> : vector<8xf32>
    %60 = vector.multi_reduction <add>, %57, %cst_27 [1] : vector<8x8xf32> to vector<8xf32>
    %61 = vector.shape_cast %60 : vector<8xf32> to vector<8x1xf32>
    %62 = arith.addf %59, %61 : vector<8x1xf32>
    %63 = tpu.reciprocal %62 {approx = true} : vector<8x1xf32> -> vector<8x1xf32>
    %cst_28 = arith.constant dense<0.000000e+00> : vector<8x8xf32>
    %64 = tpu.matmul %54, %40, %cst_28 {dimension_numbers = #tpu.dot_dimension_numbers<[1], [0], [0], [1], [0, 0, 1, 1], [], []>} : vector<8x8xf32>, vector<8x8xf32>, vector<8x8xf32> -> vector<8x8xf32>
    %cst_29 = arith.constant dense<0.000000e+00> : vector<8x8xf32>
    %65 = tpu.matmul %57, %38, %cst_29 {dimension_numbers = #tpu.dot_dimension_numbers<[1], [0], [0], [1], [0, 0, 1, 1], [], []>} : vector<8x8xf32>, vector<8x8xf32>, vector<8x8xf32> -> vector<8x8xf32>
    %66 = arith.addf %64, %65 : vector<8x8xf32>
    %67 = vector.broadcast %63 : vector<8x1xf32> to vector<8x8xf32>
    %68 = arith.mulf %66, %67 : vector<8x8xf32>
    %69 = vector.extract_strided_slice %33 {offsets = [0, 8], sizes = [8, 8], strides = [1, 1]} : vector<16x96xf32> to vector<8x8xf32>
    %70 = vector.extract_strided_slice %33 {offsets = [0, 40], sizes = [8, 8], strides = [1, 1]} : vector<16x96xf32> to vector<8x8xf32>
    %71 = vector.extract_strided_slice %33 {offsets = [0, 72], sizes = [8, 8], strides = [1, 1]} : vector<16x96xf32> to vector<8x8xf32>
    %72 = vector.extract_strided_slice %34 {offsets = [0, 8], sizes = [8, 8], strides = [1, 1]} : vector<16x32xf32> to vector<8x8xf32>
    %73 = vector.extract_strided_slice %35 {offsets = [0, 8], sizes = [8, 8], strides = [1, 1]} : vector<16x32xf32> to vector<8x8xf32>
    %cst_30 = arith.constant dense<0.000000e+00> : vector<8x8xf32>
    %74 = tpu.matmul %69, %72, %cst_30 {dimension_numbers = #tpu.dot_dimension_numbers<[1], [1], [0], [0], [0, 0, 1, 0], [], []>} : vector<8x8xf32>, vector<8x8xf32>, vector<8x8xf32> -> vector<8x8xf32>
    %cst_31 = arith.constant 0.353553385 : f32
    %75 = vector.broadcast %cst_31 : f32 to vector<8x8xf32>
    %76 = arith.mulf %74, %75 : vector<8x8xf32>
    %cst_32 = arith.constant dense<0.000000e+00> : vector<8x8xf32>
    %77 = tpu.matmul %69, %70, %cst_32 {dimension_numbers = #tpu.dot_dimension_numbers<[1], [1], [0], [0], [0, 0, 1, 0], [], []>} : vector<8x8xf32>, vector<8x8xf32>, vector<8x8xf32> -> vector<8x8xf32>
    %cst_33 = arith.constant 0.353553385 : f32
    %78 = vector.broadcast %cst_33 : f32 to vector<8x8xf32>
    %79 = arith.mulf %77, %78 : vector<8x8xf32>
    %cst_34 = arith.constant dense<0xFF800000> : vector<8xf32>
    %80 = vector.multi_reduction <maximumf>, %76, %cst_34 [1] : vector<8x8xf32> to vector<8xf32>
    %81 = vector.shape_cast %80 : vector<8xf32> to vector<8x1xf32>
    %cst_35 = arith.constant dense<0xFF800000> : vector<8xf32>
    %82 = vector.multi_reduction <maximumf>, %79, %cst_35 [1] : vector<8x8xf32> to vector<8xf32>
    %83 = vector.shape_cast %82 : vector<8xf32> to vector<8x1xf32>
    %84 = arith.maximumf %81, %83 : vector<8x1xf32>
    %85 = vector.broadcast %84 : vector<8x1xf32> to vector<8x8xf32>
    %86 = arith.subf %76, %85 : vector<8x8xf32>
    %87 = math.exp %86 : vector<8x8xf32>
    %88 = vector.broadcast %84 : vector<8x1xf32> to vector<8x8xf32>
    %89 = arith.subf %79, %88 : vector<8x8xf32>
    %90 = math.exp %89 : vector<8x8xf32>
    %cst_36 = arith.constant dense<0.000000e+00> : vector<8xf32>
    %91 = vector.multi_reduction <add>, %87, %cst_36 [1] : vector<8x8xf32> to vector<8xf32>
    %92 = vector.shape_cast %91 : vector<8xf32> to vector<8x1xf32>
    %cst_37 = arith.constant dense<0.000000e+00> : vector<8xf32>
    %93 = vector.multi_reduction <add>, %90, %cst_37 [1] : vector<8x8xf32> to vector<8xf32>
    %94 = vector.shape_cast %93 : vector<8xf32> to vector<8x1xf32>
    %95 = arith.addf %92, %94 : vector<8x1xf32>
    %96 = tpu.reciprocal %95 {approx = true} : vector<8x1xf32> -> vector<8x1xf32>
    %cst_38 = arith.constant dense<0.000000e+00> : vector<8x8xf32>
    %97 = tpu.matmul %87, %73, %cst_38 {dimension_numbers = #tpu.dot_dimension_numbers<[1], [0], [0], [1], [0, 0, 1, 1], [], []>} : vector<8x8xf32>, vector<8x8xf32>, vector<8x8xf32> -> vector<8x8xf32>
    %cst_39 = arith.constant dense<0.000000e+00> : vector<8x8xf32>
    %98 = tpu.matmul %90, %71, %cst_39 {dimension_numbers = #tpu.dot_dimension_numbers<[1], [0], [0], [1], [0, 0, 1, 1], [], []>} : vector<8x8xf32>, vector<8x8xf32>, vector<8x8xf32> -> vector<8x8xf32>
    %99 = arith.addf %97, %98 : vector<8x8xf32>
    %100 = vector.broadcast %96 : vector<8x1xf32> to vector<8x8xf32>
    %101 = arith.mulf %99, %100 : vector<8x8xf32>
    %102 = vector.extract_strided_slice %33 {offsets = [0, 16], sizes = [8, 8], strides = [1, 1]} : vector<16x96xf32> to vector<8x8xf32>
    %103 = vector.extract_strided_slice %33 {offsets = [0, 48], sizes = [8, 8], strides = [1, 1]} : vector<16x96xf32> to vector<8x8xf32>
    %104 = vector.extract_strided_slice %33 {offsets = [0, 80], sizes = [8, 8], strides = [1, 1]} : vector<16x96xf32> to vector<8x8xf32>
    %105 = vector.extract_strided_slice %34 {offsets = [0, 16], sizes = [8, 8], strides = [1, 1]} : vector<16x32xf32> to vector<8x8xf32>
    %106 = vector.extract_strided_slice %35 {offsets = [0, 16], sizes = [8, 8], strides = [1, 1]} : vector<16x32xf32> to vector<8x8xf32>
    %cst_40 = arith.constant dense<0.000000e+00> : vector<8x8xf32>
    %107 = tpu.matmul %102, %105, %cst_40 {dimension_numbers = #tpu.dot_dimension_numbers<[1], [1], [0], [0], [0, 0, 1, 0], [], []>} : vector<8x8xf32>, vector<8x8xf32>, vector<8x8xf32> -> vector<8x8xf32>
    %cst_41 = arith.constant 0.353553385 : f32
    %108 = vector.broadcast %cst_41 : f32 to vector<8x8xf32>
    %109 = arith.mulf %107, %108 : vector<8x8xf32>
    %cst_42 = arith.constant dense<0.000000e+00> : vector<8x8xf32>
    %110 = tpu.matmul %102, %103, %cst_42 {dimension_numbers = #tpu.dot_dimension_numbers<[1], [1], [0], [0], [0, 0, 1, 0], [], []>} : vector<8x8xf32>, vector<8x8xf32>, vector<8x8xf32> -> vector<8x8xf32>
    %cst_43 = arith.constant 0.353553385 : f32
    %111 = vector.broadcast %cst_43 : f32 to vector<8x8xf32>
    %112 = arith.mulf %110, %111 : vector<8x8xf32>
    %cst_44 = arith.constant dense<0xFF800000> : vector<8xf32>
    %113 = vector.multi_reduction <maximumf>, %109, %cst_44 [1] : vector<8x8xf32> to vector<8xf32>
    %114 = vector.shape_cast %113 : vector<8xf32> to vector<8x1xf32>
    %cst_45 = arith.constant dense<0xFF800000> : vector<8xf32>
    %115 = vector.multi_reduction <maximumf>, %112, %cst_45 [1] : vector<8x8xf32> to vector<8xf32>
    %116 = vector.shape_cast %115 : vector<8xf32> to vector<8x1xf32>
    %117 = arith.maximumf %114, %116 : vector<8x1xf32>
    %118 = vector.broadcast %117 : vector<8x1xf32> to vector<8x8xf32>
    %119 = arith.subf %109, %118 : vector<8x8xf32>
    %120 = math.exp %119 : vector<8x8xf32>
    %121 = vector.broadcast %117 : vector<8x1xf32> to vector<8x8xf32>
    %122 = arith.subf %112, %121 : vector<8x8xf32>
    %123 = math.exp %122 : vector<8x8xf32>
    %cst_46 = arith.constant dense<0.000000e+00> : vector<8xf32>
    %124 = vector.multi_reduction <add>, %120, %cst_46 [1] : vector<8x8xf32> to vector<8xf32>
    %125 = vector.shape_cast %124 : vector<8xf32> to vector<8x1xf32>
    %cst_47 = arith.constant dense<0.000000e+00> : vector<8xf32>
    %126 = vector.multi_reduction <add>, %123, %cst_47 [1] : vector<8x8xf32> to vector<8xf32>
    %127 = vector.shape_cast %126 : vector<8xf32> to vector<8x1xf32>
    %128 = arith.addf %125, %127 : vector<8x1xf32>
    %129 = tpu.reciprocal %128 {approx = true} : vector<8x1xf32> -> vector<8x1xf32>
    %cst_48 = arith.constant dense<0.000000e+00> : vector<8x8xf32>
    %130 = tpu.matmul %120, %106, %cst_48 {dimension_numbers = #tpu.dot_dimension_numbers<[1], [0], [0], [1], [0, 0, 1, 1], [], []>} : vector<8x8xf32>, vector<8x8xf32>, vector<8x8xf32> -> vector<8x8xf32>
    %cst_49 = arith.constant dense<0.000000e+00> : vector<8x8xf32>
    %131 = tpu.matmul %123, %104, %cst_49 {dimension_numbers = #tpu.dot_dimension_numbers<[1], [0], [0], [1], [0, 0, 1, 1], [], []>} : vector<8x8xf32>, vector<8x8xf32>, vector<8x8xf32> -> vector<8x8xf32>
    %132 = arith.addf %130, %131 : vector<8x8xf32>
    %133 = vector.broadcast %129 : vector<8x1xf32> to vector<8x8xf32>
    %134 = arith.mulf %132, %133 : vector<8x8xf32>
    %135 = vector.extract_strided_slice %33 {offsets = [0, 24], sizes = [8, 8], strides = [1, 1]} : vector<16x96xf32> to vector<8x8xf32>
    %136 = vector.extract_strided_slice %33 {offsets = [0, 56], sizes = [8, 8], strides = [1, 1]} : vector<16x96xf32> to vector<8x8xf32>
    %137 = vector.extract_strided_slice %33 {offsets = [0, 88], sizes = [8, 8], strides = [1, 1]} : vector<16x96xf32> to vector<8x8xf32>
    %138 = vector.extract_strided_slice %34 {offsets = [0, 24], sizes = [8, 8], strides = [1, 1]} : vector<16x32xf32> to vector<8x8xf32>
    %139 = vector.extract_strided_slice %35 {offsets = [0, 24], sizes = [8, 8], strides = [1, 1]} : vector<16x32xf32> to vector<8x8xf32>
    %cst_50 = arith.constant dense<0.000000e+00> : vector<8x8xf32>
    %140 = tpu.matmul %135, %138, %cst_50 {dimension_numbers = #tpu.dot_dimension_numbers<[1], [1], [0], [0], [0, 0, 1, 0], [], []>} : vector<8x8xf32>, vector<8x8xf32>, vector<8x8xf32> -> vector<8x8xf32>
    %cst_51 = arith.constant 0.353553385 : f32
    %141 = vector.broadcast %cst_51 : f32 to vector<8x8xf32>
    %142 = arith.mulf %140, %141 : vector<8x8xf32>
    %cst_52 = arith.constant dense<0.000000e+00> : vector<8x8xf32>
    %143 = tpu.matmul %135, %136, %cst_52 {dimension_numbers = #tpu.dot_dimension_numbers<[1], [1], [0], [0], [0, 0, 1, 0], [], []>} : vector<8x8xf32>, vector<8x8xf32>, vector<8x8xf32> -> vector<8x8xf32>
    %cst_53 = arith.constant 0.353553385 : f32
    %144 = vector.broadcast %cst_53 : f32 to vector<8x8xf32>
    %145 = arith.mulf %143, %144 : vector<8x8xf32>
    %cst_54 = arith.constant dense<0xFF800000> : vector<8xf32>
    %146 = vector.multi_reduction <maximumf>, %142, %cst_54 [1] : vector<8x8xf32> to vector<8xf32>
    %147 = vector.shape_cast %146 : vector<8xf32> to vector<8x1xf32>
    %cst_55 = arith.constant dense<0xFF800000> : vector<8xf32>
    %148 = vector.multi_reduction <maximumf>, %145, %cst_55 [1] : vector<8x8xf32> to vector<8xf32>
    %149 = vector.shape_cast %148 : vector<8xf32> to vector<8x1xf32>
    %150 = arith.maximumf %147, %149 : vector<8x1xf32>
    %151 = vector.broadcast %150 : vector<8x1xf32> to vector<8x8xf32>
    %152 = arith.subf %142, %151 : vector<8x8xf32>
    %153 = math.exp %152 : vector<8x8xf32>
    %154 = vector.broadcast %150 : vector<8x1xf32> to vector<8x8xf32>
    %155 = arith.subf %145, %154 : vector<8x8xf32>
    %156 = math.exp %155 : vector<8x8xf32>
    %cst_56 = arith.constant dense<0.000000e+00> : vector<8xf32>
    %157 = vector.multi_reduction <add>, %153, %cst_56 [1] : vector<8x8xf32> to vector<8xf32>
    %158 = vector.shape_cast %157 : vector<8xf32> to vector<8x1xf32>
    %cst_57 = arith.constant dense<0.000000e+00> : vector<8xf32>
    %159 = vector.multi_reduction <add>, %156, %cst_57 [1] : vector<8x8xf32> to vector<8xf32>
    %160 = vector.shape_cast %159 : vector<8xf32> to vector<8x1xf32>
    %161 = arith.addf %158, %160 : vector<8x1xf32>
    %162 = tpu.reciprocal %161 {approx = true} : vector<8x1xf32> -> vector<8x1xf32>
    %cst_58 = arith.constant dense<0.000000e+00> : vector<8x8xf32>
    %163 = tpu.matmul %153, %139, %cst_58 {dimension_numbers = #tpu.dot_dimension_numbers<[1], [0], [0], [1], [0, 0, 1, 1], [], []>} : vector<8x8xf32>, vector<8x8xf32>, vector<8x8xf32> -> vector<8x8xf32>
    %cst_59 = arith.constant dense<0.000000e+00> : vector<8x8xf32>
    %164 = tpu.matmul %156, %137, %cst_59 {dimension_numbers = #tpu.dot_dimension_numbers<[1], [0], [0], [1], [0, 0, 1, 1], [], []>} : vector<8x8xf32>, vector<8x8xf32>, vector<8x8xf32> -> vector<8x8xf32>
    %165 = arith.addf %163, %164 : vector<8x8xf32>
    %166 = vector.broadcast %162 : vector<8x1xf32> to vector<8x8xf32>
    %167 = arith.mulf %165, %166 : vector<8x8xf32>
    %168 = tpu.concatenate %68, %101, %134, %167 in 1 : vector<8x8xf32>, vector<8x8xf32>, vector<8x8xf32>, vector<8x8xf32> -> vector<8x32xf32>
    %169 = vector.extract_strided_slice %33 {offsets = [8, 0], sizes = [8, 8], strides = [1, 1]} : vector<16x96xf32> to vector<8x8xf32>
    %170 = vector.extract_strided_slice %33 {offsets = [8, 32], sizes = [8, 8], strides = [1, 1]} : vector<16x96xf32> to vector<8x8xf32>
    %171 = vector.extract_strided_slice %33 {offsets = [8, 64], sizes = [8, 8], strides = [1, 1]} : vector<16x96xf32> to vector<8x8xf32>
    %172 = vector.extract_strided_slice %34 {offsets = [8, 0], sizes = [8, 8], strides = [1, 1]} : vector<16x32xf32> to vector<8x8xf32>
    %173 = vector.extract_strided_slice %35 {offsets = [8, 0], sizes = [8, 8], strides = [1, 1]} : vector<16x32xf32> to vector<8x8xf32>
    %cst_60 = arith.constant dense<0.000000e+00> : vector<8x8xf32>
    %174 = tpu.matmul %169, %172, %cst_60 {dimension_numbers = #tpu.dot_dimension_numbers<[1], [1], [0], [0], [0, 0, 1, 0], [], []>} : vector<8x8xf32>, vector<8x8xf32>, vector<8x8xf32> -> vector<8x8xf32>
    %cst_61 = arith.constant 0.353553385 : f32
    %175 = vector.broadcast %cst_61 : f32 to vector<8x8xf32>
    %176 = arith.mulf %174, %175 : vector<8x8xf32>
    %cst_62 = arith.constant dense<0.000000e+00> : vector<8x8xf32>
    %177 = tpu.matmul %169, %170, %cst_62 {dimension_numbers = #tpu.dot_dimension_numbers<[1], [1], [0], [0], [0, 0, 1, 0], [], []>} : vector<8x8xf32>, vector<8x8xf32>, vector<8x8xf32> -> vector<8x8xf32>
    %cst_63 = arith.constant 0.353553385 : f32
    %178 = vector.broadcast %cst_63 : f32 to vector<8x8xf32>
    %179 = arith.mulf %177, %178 : vector<8x8xf32>
    %cst_64 = arith.constant dense<0xFF800000> : vector<8xf32>
    %180 = vector.multi_reduction <maximumf>, %176, %cst_64 [1] : vector<8x8xf32> to vector<8xf32>
    %181 = vector.shape_cast %180 : vector<8xf32> to vector<8x1xf32>
    %cst_65 = arith.constant dense<0xFF800000> : vector<8xf32>
    %182 = vector.multi_reduction <maximumf>, %179, %cst_65 [1] : vector<8x8xf32> to vector<8xf32>
    %183 = vector.shape_cast %182 : vector<8xf32> to vector<8x1xf32>
    %184 = arith.maximumf %181, %183 : vector<8x1xf32>
    %185 = vector.broadcast %184 : vector<8x1xf32> to vector<8x8xf32>
    %186 = arith.subf %176, %185 : vector<8x8xf32>
    %187 = math.exp %186 : vector<8x8xf32>
    %188 = vector.broadcast %184 : vector<8x1xf32> to vector<8x8xf32>
    %189 = arith.subf %179, %188 : vector<8x8xf32>
    %190 = math.exp %189 : vector<8x8xf32>
    %cst_66 = arith.constant dense<0.000000e+00> : vector<8xf32>
    %191 = vector.multi_reduction <add>, %187, %cst_66 [1] : vector<8x8xf32> to vector<8xf32>
    %192 = vector.shape_cast %191 : vector<8xf32> to vector<8x1xf32>
    %cst_67 = arith.constant dense<0.000000e+00> : vector<8xf32>
    %193 = vector.multi_reduction <add>, %190, %cst_67 [1] : vector<8x8xf32> to vector<8xf32>
    %194 = vector.shape_cast %193 : vector<8xf32> to vector<8x1xf32>
    %195 = arith.addf %192, %194 : vector<8x1xf32>
    %196 = tpu.reciprocal %195 {approx = true} : vector<8x1xf32> -> vector<8x1xf32>
    %cst_68 = arith.constant dense<0.000000e+00> : vector<8x8xf32>
    %197 = tpu.matmul %187, %173, %cst_68 {dimension_numbers = #tpu.dot_dimension_numbers<[1], [0], [0], [1], [0, 0, 1, 1], [], []>} : vector<8x8xf32>, vector<8x8xf32>, vector<8x8xf32> -> vector<8x8xf32>
    %cst_69 = arith.constant dense<0.000000e+00> : vector<8x8xf32>
    %198 = tpu.matmul %190, %171, %cst_69 {dimension_numbers = #tpu.dot_dimension_numbers<[1], [0], [0], [1], [0, 0, 1, 1], [], []>} : vector<8x8xf32>, vector<8x8xf32>, vector<8x8xf32> -> vector<8x8xf32>
    %199 = arith.addf %197, %198 : vector<8x8xf32>
    %200 = vector.broadcast %196 : vector<8x1xf32> to vector<8x8xf32>
    %201 = arith.mulf %199, %200 : vector<8x8xf32>
    %202 = vector.extract_strided_slice %33 {offsets = [8, 8], sizes = [8, 8], strides = [1, 1]} : vector<16x96xf32> to vector<8x8xf32>
    %203 = vector.extract_strided_slice %33 {offsets = [8, 40], sizes = [8, 8], strides = [1, 1]} : vector<16x96xf32> to vector<8x8xf32>
    %204 = vector.extract_strided_slice %33 {offsets = [8, 72], sizes = [8, 8], strides = [1, 1]} : vector<16x96xf32> to vector<8x8xf32>
    %205 = vector.extract_strided_slice %34 {offsets = [8, 8], sizes = [8, 8], strides = [1, 1]} : vector<16x32xf32> to vector<8x8xf32>
    %206 = vector.extract_strided_slice %35 {offsets = [8, 8], sizes = [8, 8], strides = [1, 1]} : vector<16x32xf32> to vector<8x8xf32>
    %cst_70 = arith.constant dense<0.000000e+00> : vector<8x8xf32>
    %207 = tpu.matmul %202, %205, %cst_70 {dimension_numbers = #tpu.dot_dimension_numbers<[1], [1], [0], [0], [0, 0, 1, 0], [], []>} : vector<8x8xf32>, vector<8x8xf32>, vector<8x8xf32> -> vector<8x8xf32>
    %cst_71 = arith.constant 0.353553385 : f32
    %208 = vector.broadcast %cst_71 : f32 to vector<8x8xf32>
    %209 = arith.mulf %207, %208 : vector<8x8xf32>
    %cst_72 = arith.constant dense<0.000000e+00> : vector<8x8xf32>
    %210 = tpu.matmul %202, %203, %cst_72 {dimension_numbers = #tpu.dot_dimension_numbers<[1], [1], [0], [0], [0, 0, 1, 0], [], []>} : vector<8x8xf32>, vector<8x8xf32>, vector<8x8xf32> -> vector<8x8xf32>
    %cst_73 = arith.constant 0.353553385 : f32
    %211 = vector.broadcast %cst_73 : f32 to vector<8x8xf32>
    %212 = arith.mulf %210, %211 : vector<8x8xf32>
    %cst_74 = arith.constant dense<0xFF800000> : vector<8xf32>
    %213 = vector.multi_reduction <maximumf>, %209, %cst_74 [1] : vector<8x8xf32> to vector<8xf32>
    %214 = vector.shape_cast %213 : vector<8xf32> to vector<8x1xf32>
    %cst_75 = arith.constant dense<0xFF800000> : vector<8xf32>
    %215 = vector.multi_reduction <maximumf>, %212, %cst_75 [1] : vector<8x8xf32> to vector<8xf32>
    %216 = vector.shape_cast %215 : vector<8xf32> to vector<8x1xf32>
    %217 = arith.maximumf %214, %216 : vector<8x1xf32>
    %218 = vector.broadcast %217 : vector<8x1xf32> to vector<8x8xf32>
    %219 = arith.subf %209, %218 : vector<8x8xf32>
    %220 = math.exp %219 : vector<8x8xf32>
    %221 = vector.broadcast %217 : vector<8x1xf32> to vector<8x8xf32>
    %222 = arith.subf %212, %221 : vector<8x8xf32>
    %223 = math.exp %222 : vector<8x8xf32>
    %cst_76 = arith.constant dense<0.000000e+00> : vector<8xf32>
    %224 = vector.multi_reduction <add>, %220, %cst_76 [1] : vector<8x8xf32> to vector<8xf32>
    %225 = vector.shape_cast %224 : vector<8xf32> to vector<8x1xf32>
    %cst_77 = arith.constant dense<0.000000e+00> : vector<8xf32>
    %226 = vector.multi_reduction <add>, %223, %cst_77 [1] : vector<8x8xf32> to vector<8xf32>
    %227 = vector.shape_cast %226 : vector<8xf32> to vector<8x1xf32>
    %228 = arith.addf %225, %227 : vector<8x1xf32>
    %229 = tpu.reciprocal %228 {approx = true} : vector<8x1xf32> -> vector<8x1xf32>
    %cst_78 = arith.constant dense<0.000000e+00> : vector<8x8xf32>
    %230 = tpu.matmul %220, %206, %cst_78 {dimension_numbers = #tpu.dot_dimension_numbers<[1], [0], [0], [1], [0, 0, 1, 1], [], []>} : vector<8x8xf32>, vector<8x8xf32>, vector<8x8xf32> -> vector<8x8xf32>
    %cst_79 = arith.constant dense<0.000000e+00> : vector<8x8xf32>
    %231 = tpu.matmul %223, %204, %cst_79 {dimension_numbers = #tpu.dot_dimension_numbers<[1], [0], [0], [1], [0, 0, 1, 1], [], []>} : vector<8x8xf32>, vector<8x8xf32>, vector<8x8xf32> -> vector<8x8xf32>
    %232 = arith.addf %230, %231 : vector<8x8xf32>
    %233 = vector.broadcast %229 : vector<8x1xf32> to vector<8x8xf32>
    %234 = arith.mulf %232, %233 : vector<8x8xf32>
    %235 = vector.extract_strided_slice %33 {offsets = [8, 16], sizes = [8, 8], strides = [1, 1]} : vector<16x96xf32> to vector<8x8xf32>
    %236 = vector.extract_strided_slice %33 {offsets = [8, 48], sizes = [8, 8], strides = [1, 1]} : vector<16x96xf32> to vector<8x8xf32>
    %237 = vector.extract_strided_slice %33 {offsets = [8, 80], sizes = [8, 8], strides = [1, 1]} : vector<16x96xf32> to vector<8x8xf32>
    %238 = vector.extract_strided_slice %34 {offsets = [8, 16], sizes = [8, 8], strides = [1, 1]} : vector<16x32xf32> to vector<8x8xf32>
    %239 = vector.extract_strided_slice %35 {offsets = [8, 16], sizes = [8, 8], strides = [1, 1]} : vector<16x32xf32> to vector<8x8xf32>
    %cst_80 = arith.constant dense<0.000000e+00> : vector<8x8xf32>
    %240 = tpu.matmul %235, %238, %cst_80 {dimension_numbers = #tpu.dot_dimension_numbers<[1], [1], [0], [0], [0, 0, 1, 0], [], []>} : vector<8x8xf32>, vector<8x8xf32>, vector<8x8xf32> -> vector<8x8xf32>
    %cst_81 = arith.constant 0.353553385 : f32
    %241 = vector.broadcast %cst_81 : f32 to vector<8x8xf32>
    %242 = arith.mulf %240, %241 : vector<8x8xf32>
    %cst_82 = arith.constant dense<0.000000e+00> : vector<8x8xf32>
    %243 = tpu.matmul %235, %236, %cst_82 {dimension_numbers = #tpu.dot_dimension_numbers<[1], [1], [0], [0], [0, 0, 1, 0], [], []>} : vector<8x8xf32>, vector<8x8xf32>, vector<8x8xf32> -> vector<8x8xf32>
    %cst_83 = arith.constant 0.353553385 : f32
    %244 = vector.broadcast %cst_83 : f32 to vector<8x8xf32>
    %245 = arith.mulf %243, %244 : vector<8x8xf32>
    %cst_84 = arith.constant dense<0xFF800000> : vector<8xf32>
    %246 = vector.multi_reduction <maximumf>, %242, %cst_84 [1] : vector<8x8xf32> to vector<8xf32>
    %247 = vector.shape_cast %246 : vector<8xf32> to vector<8x1xf32>
    %cst_85 = arith.constant dense<0xFF800000> : vector<8xf32>
    %248 = vector.multi_reduction <maximumf>, %245, %cst_85 [1] : vector<8x8xf32> to vector<8xf32>
    %249 = vector.shape_cast %248 : vector<8xf32> to vector<8x1xf32>
    %250 = arith.maximumf %247, %249 : vector<8x1xf32>
    %251 = vector.broadcast %250 : vector<8x1xf32> to vector<8x8xf32>
    %252 = arith.subf %242, %251 : vector<8x8xf32>
    %253 = math.exp %252 : vector<8x8xf32>
    %254 = vector.broadcast %250 : vector<8x1xf32> to vector<8x8xf32>
    %255 = arith.subf %245, %254 : vector<8x8xf32>
    %256 = math.exp %255 : vector<8x8xf32>
    %cst_86 = arith.constant dense<0.000000e+00> : vector<8xf32>
    %257 = vector.multi_reduction <add>, %253, %cst_86 [1] : vector<8x8xf32> to vector<8xf32>
    %258 = vector.shape_cast %257 : vector<8xf32> to vector<8x1xf32>
    %cst_87 = arith.constant dense<0.000000e+00> : vector<8xf32>
    %259 = vector.multi_reduction <add>, %256, %cst_87 [1] : vector<8x8xf32> to vector<8xf32>
    %260 = vector.shape_cast %259 : vector<8xf32> to vector<8x1xf32>
    %261 = arith.addf %258, %260 : vector<8x1xf32>
    %262 = tpu.reciprocal %261 {approx = true} : vector<8x1xf32> -> vector<8x1xf32>
    %cst_88 = arith.constant dense<0.000000e+00> : vector<8x8xf32>
    %263 = tpu.matmul %253, %239, %cst_88 {dimension_numbers = #tpu.dot_dimension_numbers<[1], [0], [0], [1], [0, 0, 1, 1], [], []>} : vector<8x8xf32>, vector<8x8xf32>, vector<8x8xf32> -> vector<8x8xf32>
    %cst_89 = arith.constant dense<0.000000e+00> : vector<8x8xf32>
    %264 = tpu.matmul %256, %237, %cst_89 {dimension_numbers = #tpu.dot_dimension_numbers<[1], [0], [0], [1], [0, 0, 1, 1], [], []>} : vector<8x8xf32>, vector<8x8xf32>, vector<8x8xf32> -> vector<8x8xf32>
    %265 = arith.addf %263, %264 : vector<8x8xf32>
    %266 = vector.broadcast %262 : vector<8x1xf32> to vector<8x8xf32>
    %267 = arith.mulf %265, %266 : vector<8x8xf32>
    %268 = vector.extract_strided_slice %33 {offsets = [8, 24], sizes = [8, 8], strides = [1, 1]} : vector<16x96xf32> to vector<8x8xf32>
    %269 = vector.extract_strided_slice %33 {offsets = [8, 56], sizes = [8, 8], strides = [1, 1]} : vector<16x96xf32> to vector<8x8xf32>
    %270 = vector.extract_strided_slice %33 {offsets = [8, 88], sizes = [8, 8], strides = [1, 1]} : vector<16x96xf32> to vector<8x8xf32>
    %271 = vector.extract_strided_slice %34 {offsets = [8, 24], sizes = [8, 8], strides = [1, 1]} : vector<16x32xf32> to vector<8x8xf32>
    %272 = vector.extract_strided_slice %35 {offsets = [8, 24], sizes = [8, 8], strides = [1, 1]} : vector<16x32xf32> to vector<8x8xf32>
    %cst_90 = arith.constant dense<0.000000e+00> : vector<8x8xf32>
    %273 = tpu.matmul %268, %271, %cst_90 {dimension_numbers = #tpu.dot_dimension_numbers<[1], [1], [0], [0], [0, 0, 1, 0], [], []>} : vector<8x8xf32>, vector<8x8xf32>, vector<8x8xf32> -> vector<8x8xf32>
    %cst_91 = arith.constant 0.353553385 : f32
    %274 = vector.broadcast %cst_91 : f32 to vector<8x8xf32>
    %275 = arith.mulf %273, %274 : vector<8x8xf32>
    %cst_92 = arith.constant dense<0.000000e+00> : vector<8x8xf32>
    %276 = tpu.matmul %268, %269, %cst_92 {dimension_numbers = #tpu.dot_dimension_numbers<[1], [1], [0], [0], [0, 0, 1, 0], [], []>} : vector<8x8xf32>, vector<8x8xf32>, vector<8x8xf32> -> vector<8x8xf32>
    %cst_93 = arith.constant 0.353553385 : f32
    %277 = vector.broadcast %cst_93 : f32 to vector<8x8xf32>
    %278 = arith.mulf %276, %277 : vector<8x8xf32>
    %cst_94 = arith.constant dense<0xFF800000> : vector<8xf32>
    %279 = vector.multi_reduction <maximumf>, %275, %cst_94 [1] : vector<8x8xf32> to vector<8xf32>
    %280 = vector.shape_cast %279 : vector<8xf32> to vector<8x1xf32>
    %cst_95 = arith.constant dense<0xFF800000> : vector<8xf32>
    %281 = vector.multi_reduction <maximumf>, %278, %cst_95 [1] : vector<8x8xf32> to vector<8xf32>
    %282 = vector.shape_cast %281 : vector<8xf32> to vector<8x1xf32>
    %283 = arith.maximumf %280, %282 : vector<8x1xf32>
    %284 = vector.broadcast %283 : vector<8x1xf32> to vector<8x8xf32>
    %285 = arith.subf %275, %284 : vector<8x8xf32>
    %286 = math.exp %285 : vector<8x8xf32>
    %287 = vector.broadcast %283 : vector<8x1xf32> to vector<8x8xf32>
    %288 = arith.subf %278, %287 : vector<8x8xf32>
    %289 = math.exp %288 : vector<8x8xf32>
    %cst_96 = arith.constant dense<0.000000e+00> : vector<8xf32>
    %290 = vector.multi_reduction <add>, %286, %cst_96 [1] : vector<8x8xf32> to vector<8xf32>
    %291 = vector.shape_cast %290 : vector<8xf32> to vector<8x1xf32>
    %cst_97 = arith.constant dense<0.000000e+00> : vector<8xf32>
    %292 = vector.multi_reduction <add>, %289, %cst_97 [1] : vector<8x8xf32> to vector<8xf32>
    %293 = vector.shape_cast %292 : vector<8xf32> to vector<8x1xf32>
    %294 = arith.addf %291, %293 : vector<8x1xf32>
    %295 = tpu.reciprocal %294 {approx = true} : vector<8x1xf32> -> vector<8x1xf32>
    %cst_98 = arith.constant dense<0.000000e+00> : vector<8x8xf32>
    %296 = tpu.matmul %286, %272, %cst_98 {dimension_numbers = #tpu.dot_dimension_numbers<[1], [0], [0], [1], [0, 0, 1, 1], [], []>} : vector<8x8xf32>, vector<8x8xf32>, vector<8x8xf32> -> vector<8x8xf32>
    %cst_99 = arith.constant dense<0.000000e+00> : vector<8x8xf32>
    %297 = tpu.matmul %289, %270, %cst_99 {dimension_numbers = #tpu.dot_dimension_numbers<[1], [0], [0], [1], [0, 0, 1, 1], [], []>} : vector<8x8xf32>, vector<8x8xf32>, vector<8x8xf32> -> vector<8x8xf32>
    %298 = arith.addf %296, %297 : vector<8x8xf32>
    %299 = vector.broadcast %295 : vector<8x1xf32> to vector<8x8xf32>
    %300 = arith.mulf %298, %299 : vector<8x8xf32>
    %301 = tpu.concatenate %201, %234, %267, %300 in 1 : vector<8x8xf32>, vector<8x8xf32>, vector<8x8xf32>, vector<8x8xf32> -> vector<8x32xf32>
    %302 = tpu.concatenate %168, %301 in 0 : vector<8x32xf32>, vector<8x32xf32> -> vector<16x32xf32>
    %c0_100 = arith.constant 0 : index
    %c0_101 = arith.constant 0 : index
    %303 = vector.load %arg9[%c0_100, %c0_101] : memref<32x128xf32, #tpu.memory_space<vmem>>, vector<32x128xf32>
    %cst_102 = arith.constant dense<0.000000e+00> : vector<16x128xf32>
    %304 = tpu.matmul %302, %303, %cst_102 {dimension_numbers = #tpu.dot_dimension_numbers<[1], [0], [0], [1], [0, 0, 1, 1], [], []>} : vector<16x32xf32>, vector<32x128xf32>, vector<16x128xf32> -> vector<16x128xf32>
    %c0_103 = arith.constant 0 : index
    %c0_104 = arith.constant 0 : index
    %305 = vector.load %arg10[%c0_103, %c0_104] : memref<1x128xf32, #tpu.memory_space<vmem>>, vector<1x128xf32>
    %306 = vector.broadcast %305 : vector<1x128xf32> to vector<16x128xf32>
    %307 = arith.addf %304, %306 : vector<16x128xf32>
    %cst_105 = arith.constant 5.000000e-01 : f32
    %308 = vector.broadcast %cst_105 : f32 to vector<16x128xf32>
    %309 = arith.mulf %308, %307 : vector<16x128xf32>
    %310 = arith.mulf %307, %307 : vector<16x128xf32>
    %311 = arith.mulf %307, %310 : vector<16x128xf32>
    %cst_106 = arith.constant 4.471500e-02 : f32
    %312 = vector.broadcast %cst_106 : f32 to vector<16x128xf32>
    %313 = arith.mulf %312, %311 : vector<16x128xf32>
    %314 = arith.addf %307, %313 : vector<16x128xf32>
    %cst_107 = arith.constant 0.797884583 : f32
    %315 = vector.broadcast %cst_107 : f32 to vector<16x128xf32>
    %316 = arith.mulf %315, %314 : vector<16x128xf32>
    %317 = math.tanh %316 : vector<16x128xf32>
    %cst_108 = arith.constant 1.000000e+00 : f32
    %318 = vector.broadcast %cst_108 : f32 to vector<16x128xf32>
    %319 = arith.addf %318, %317 : vector<16x128xf32>
    %320 = arith.mulf %309, %319 : vector<16x128xf32>
    %c0_109 = arith.constant 0 : index
    %c0_110 = arith.constant 0 : index
    %321 = vector.load %arg11[%c0_109, %c0_110] : memref<128x32xf32, #tpu.memory_space<vmem>>, vector<128x32xf32>
    %cst_111 = arith.constant dense<0.000000e+00> : vector<16x32xf32>
    %322 = tpu.matmul %320, %321, %cst_111 {dimension_numbers = #tpu.dot_dimension_numbers<[1], [0], [0], [1], [0, 0, 1, 1], [], []>} : vector<16x128xf32>, vector<128x32xf32>, vector<16x32xf32> -> vector<16x32xf32>
    %c0_112 = arith.constant 0 : index
    %c0_113 = arith.constant 0 : index
    %323 = vector.load %arg12[%c0_112, %c0_113] : memref<1x32xf32, #tpu.memory_space<vmem>>, vector<1x32xf32>
    %324 = vector.broadcast %323 : vector<1x32xf32> to vector<16x32xf32>
    %325 = arith.addf %322, %324 : vector<16x32xf32>
    %c0_114 = arith.constant 0 : index
    %c0_115 = arith.constant 0 : index
    %326 = vector.load %arg13[%c0_114, %c0_115] : memref<1x32xf32, #tpu.memory_space<vmem>>, vector<1x32xf32>
    %c0_116 = arith.constant 0 : index
    %c0_117 = arith.constant 0 : index
    %327 = vector.load %arg14[%c0_116, %c0_117] : memref<1x32xf32, #tpu.memory_space<vmem>>, vector<1x32xf32>
    %cst_118 = arith.constant dense<0.000000e+00> : vector<16xf32>
    %328 = vector.multi_reduction <add>, %325, %cst_118 [1] : vector<16x32xf32> to vector<16xf32>
    %329 = vector.shape_cast %328 : vector<16xf32> to vector<16x1xf32>
    %cst_119 = arith.constant 3.200000e+01 : f32
    %330 = vector.broadcast %cst_119 : f32 to vector<16x1xf32>
    %331 = arith.divf %329, %330 : vector<16x1xf32>
    %332 = vector.broadcast %331 : vector<16x1xf32> to vector<16x32xf32>
    %333 = arith.subf %325, %332 : vector<16x32xf32>
    %334 = arith.mulf %333, %333 : vector<16x32xf32>
    %cst_120 = arith.constant dense<0.000000e+00> : vector<16xf32>
    %335 = vector.multi_reduction <add>, %334, %cst_120 [1] : vector<16x32xf32> to vector<16xf32>
    %336 = vector.shape_cast %335 : vector<16xf32> to vector<16x1xf32>
    %cst_121 = arith.constant 3.200000e+01 : f32
    %337 = vector.broadcast %cst_121 : f32 to vector<16x1xf32>
    %338 = arith.divf %336, %337 : vector<16x1xf32>
    %339 = vector.broadcast %331 : vector<16x1xf32> to vector<16x32xf32>
    %340 = arith.subf %325, %339 : vector<16x32xf32>
    %cst_122 = arith.constant 9.99999974E-6 : f32
    %341 = vector.broadcast %cst_122 : f32 to vector<16x1xf32>
    %342 = arith.addf %338, %341 : vector<16x1xf32>
    %343 = math.rsqrt %342 : vector<16x1xf32>
    %344 = vector.broadcast %343 : vector<16x1xf32> to vector<16x32xf32>
    %345 = arith.mulf %340, %344 : vector<16x32xf32>
    %346 = vector.broadcast %326 : vector<1x32xf32> to vector<16x32xf32>
    %347 = arith.mulf %345, %346 : vector<16x32xf32>
    %348 = vector.broadcast %327 : vector<1x32xf32> to vector<16x32xf32>
    %349 = arith.addf %347, %348 : vector<16x32xf32>
    %c0_123 = arith.constant 0 : index
    %c0_124 = arith.constant 0 : index
    %350 = vector.load %arg9[%c0_123, %c0_124] : memref<32x128xf32, #tpu.memory_space<vmem>>, vector<32x128xf32>
    %cst_125 = arith.constant dense<0.000000e+00> : vector<16x128xf32>
    %351 = tpu.matmul %349, %350, %cst_125 {dimension_numbers = #tpu.dot_dimension_numbers<[1], [0], [0], [1], [0, 0, 1, 1], [], []>} : vector<16x32xf32>, vector<32x128xf32>, vector<16x128xf32> -> vector<16x128xf32>
    %c0_126 = arith.constant 0 : index
    %c0_127 = arith.constant 0 : index
    %352 = vector.load %arg10[%c0_126, %c0_127] : memref<1x128xf32, #tpu.memory_space<vmem>>, vector<1x128xf32>
    %353 = vector.broadcast %352 : vector<1x128xf32> to vector<16x128xf32>
    %354 = arith.addf %351, %353 : vector<16x128xf32>
    %cst_128 = arith.constant 5.000000e-01 : f32
    %355 = vector.broadcast %cst_128 : f32 to vector<16x128xf32>
    %356 = arith.mulf %355, %354 : vector<16x128xf32>
    %357 = arith.mulf %354, %354 : vector<16x128xf32>
    %358 = arith.mulf %354, %357 : vector<16x128xf32>
    %cst_129 = arith.constant 4.471500e-02 : f32
    %359 = vector.broadcast %cst_129 : f32 to vector<16x128xf32>
    %360 = arith.mulf %359, %358 : vector<16x128xf32>
    %361 = arith.addf %354, %360 : vector<16x128xf32>
    %cst_130 = arith.constant 0.797884583 : f32
    %362 = vector.broadcast %cst_130 : f32 to vector<16x128xf32>
    %363 = arith.mulf %362, %361 : vector<16x128xf32>
    %364 = math.tanh %363 : vector<16x128xf32>
    %cst_131 = arith.constant 1.000000e+00 : f32
    %365 = vector.broadcast %cst_131 : f32 to vector<16x128xf32>
    %366 = arith.addf %365, %364 : vector<16x128xf32>
    %367 = arith.mulf %356, %366 : vector<16x128xf32>
    %c0_132 = arith.constant 0 : index
    %c0_133 = arith.constant 0 : index
    %368 = vector.load %arg11[%c0_132, %c0_133] : memref<128x32xf32, #tpu.memory_space<vmem>>, vector<128x32xf32>
    %cst_134 = arith.constant dense<0.000000e+00> : vector<16x32xf32>
    %369 = tpu.matmul %367, %368, %cst_134 {dimension_numbers = #tpu.dot_dimension_numbers<[1], [0], [0], [1], [0, 0, 1, 1], [], []>} : vector<16x128xf32>, vector<128x32xf32>, vector<16x32xf32> -> vector<16x32xf32>
    %c0_135 = arith.constant 0 : index
    %c0_136 = arith.constant 0 : index
    %370 = vector.load %arg12[%c0_135, %c0_136] : memref<1x32xf32, #tpu.memory_space<vmem>>, vector<1x32xf32>
    %371 = vector.broadcast %370 : vector<1x32xf32> to vector<16x32xf32>
    %372 = arith.addf %369, %371 : vector<16x32xf32>
    %373 = arith.addf %28, %372 : vector<16x32xf32>
    %c0_137 = arith.constant 0 : index
    %c0_138 = arith.constant 0 : index
    %374 = vector.load %arg15[%c0_137, %c0_138] : memref<32x128xf32, #tpu.memory_space<vmem>>, vector<32x128xf32>
    %cst_139 = arith.constant dense<0.000000e+00> : vector<16x128xf32>
    %375 = tpu.matmul %373, %374, %cst_139 {dimension_numbers = #tpu.dot_dimension_numbers<[1], [0], [0], [1], [0, 0, 1, 1], [], []>} : vector<16x32xf32>, vector<32x128xf32>, vector<16x128xf32> -> vector<16x128xf32>
    %c0_140 = arith.constant 0 : index
    %c0_141 = arith.constant 0 : index
    %376 = vector.load %arg16[%c0_140, %c0_141] : memref<1x128xf32, #tpu.memory_space<vmem>>, vector<1x128xf32>
    %377 = vector.broadcast %376 : vector<1x128xf32> to vector<16x128xf32>
    %378 = arith.addf %375, %377 : vector<16x128xf32>
    %c0_142 = arith.constant 0 : index
    %c0_143 = arith.constant 0 : index
    %379 = vector.load %arg17[%c0_142, %c0_143] : memref<16x128xf32, #tpu.memory_space<vmem>>, vector<16x128xf32>
    tpu.vector_store %arg17[%c0_142, %c0_143], %378 {strides = array<i32>} : memref<16x128xf32, #tpu.memory_space<vmem>>, vector<16x128xf32>,
    %380 = vector.extract_strided_slice %373 {offsets = [0, 0], sizes = [4, 32], strides = [1, 1]} : vector<16x32xf32> to vector<4x32xf32>
    %381 = vector.extract_strided_slice %373 {offsets = [8, 0], sizes = [4, 32], strides = [1, 1]} : vector<16x32xf32> to vector<4x32xf32>
    %382 = tpu.concatenate %380, %381 in 0 : vector<4x32xf32>, vector<4x32xf32> -> vector<8x32xf32>
    %c0_144 = arith.constant 0 : index
    %c0_145 = arith.constant 0 : index
    %383 = vector.load %arg18[%c0_144, %c0_145] : memref<8x32xf32, #tpu.memory_space<vmem>>, vector<8x32xf32>
    tpu.vector_store %arg18[%c0_144, %c0_145], %382 {strides = array<i32>} : memref<8x32xf32, #tpu.memory_space<vmem>>, vector<8x32xf32>,
    return
  }
  func.func @transform_0(%arg0: i32) -> (i32, i32) {
    %c0_i32 = arith.constant 0 : i32
    %c0_i32_0 = arith.constant 0 : i32
    return %arg0, %c0_i32 : i32, i32
  }
  func.func @transform_1(%arg0: i32) -> (i32, i32) {
    %c0_i32 = arith.constant 0 : i32
    %c0_i32_0 = arith.constant 0 : i32
    return %arg0, %c0_i32 : i32, i32
  }
  func.func @transform_2(%arg0: i32) -> (i32, i32) {
    %c0_i32 = arith.constant 0 : i32
    %c0_i32_0 = arith.constant 0 : i32
    return %arg0, %c0_i32 : i32, i32
  }
  func.func @transform_3(%arg0: i32) -> (i32, i32) {
    %c0_i32 = arith.constant 0 : i32
    %c0_i32_0 = arith.constant 0 : i32
    %c0_i32_1 = arith.constant 0 : i32
    return %c0_i32, %c0_i32_0 : i32, i32
  }
  func.func @transform_4(%arg0: i32) -> (i32, i32) {
    %c0_i32 = arith.constant 0 : i32
    %c0_i32_0 = arith.constant 0 : i32
    %c0_i32_1 = arith.constant 0 : i32
    return %c0_i32, %c0_i32_0 : i32, i32
  }
  func.func @transform_5(%arg0: i32) -> (i32, i32) {
    %c0_i32 = arith.constant 0 : i32
    %c0_i32_0 = arith.constant 0 : i32
    %c0_i32_1 = arith.constant 0 : i32
    return %c0_i32, %c0_i32_0 : i32, i32
  }
  func.func @transform_6(%arg0: i32) -> (i32, i32) {
    %c0_i32 = arith.constant 0 : i32
    %c0_i32_0 = arith.constant 0 : i32
    %c0_i32_1 = arith.constant 0 : i32
    return %c0_i32, %c0_i32_0 : i32, i32
  }
  func.func @transform_7(%arg0: i32) -> (i32, i32) {
    %c0_i32 = arith.constant 0 : i32
    %c0_i32_0 = arith.constant 0 : i32
    %c0_i32_1 = arith.constant 0 : i32
    return %c0_i32, %c0_i32_0 : i32, i32
  }
  func.func @transform_8(%arg0: i32) -> (i32, i32) {
    %c0_i32 = arith.constant 0 : i32
    %c0_i32_0 = arith.constant 0 : i32
    %c0_i32_1 = arith.constant 0 : i32
    return %c0_i32, %c0_i32_0 : i32, i32
  }
  func.func @transform_9(%arg0: i32) -> (i32, i32) {
    %c0_i32 = arith.constant 0 : i32
    %c0_i32_0 = arith.constant 0 : i32
    %c0_i32_1 = arith.constant 0 : i32
    return %c0_i32, %c0_i32_0 : i32, i32
  }
  func.func @transform_10(%arg0: i32) -> (i32, i32) {
    %c0_i32 = arith.constant 0 : i32
    %c0_i32_0 = arith.constant 0 : i32
    %c0_i32_1 = arith.constant 0 : i32
    return %c0_i32, %c0_i32_0 : i32, i32
  }
  func.func @transform_11(%arg0: i32) -> (i32, i32) {
    %c0_i32 = arith.constant 0 : i32
    %c0_i32_0 = arith.constant 0 : i32
    %c0_i32_1 = arith.constant 0 : i32
    return %c0_i32, %c0_i32_0 : i32, i32
  }
  func.func @transform_12(%arg0: i32) -> (i32, i32) {
    %c0_i32 = arith.constant 0 : i32
    %c0_i32_0 = arith.constant 0 : i32
    %c0_i32_1 = arith.constant 0 : i32
    return %c0_i32, %c0_i32_0 : i32, i32
  }
  func.func @transform_13(%arg0: i32) -> (i32, i32) {
    %c0_i32 = arith.constant 0 : i32
    %c0_i32_0 = arith.constant 0 : i32
    %c0_i32_1 = arith.constant 0 : i32
    return %c0_i32, %c0_i32_0 : i32, i32
  }
  func.func @transform_14(%arg0: i32) -> (i32, i32) {
    %c0_i32 = arith.constant 0 : i32
    %c0_i32_0 = arith.constant 0 : i32
    %c0_i32_1 = arith.constant 0 : i32
    return %c0_i32, %c0_i32_0 : i32, i32
  }
  func.func @transform_15(%arg0: i32) -> (i32, i32) {
    %c0_i32 = arith.constant 0 : i32
    %c0_i32_0 = arith.constant 0 : i32
    %c0_i32_1 = arith.constant 0 : i32
    return %c0_i32, %c0_i32_0 : i32, i32
  }
  func.func @transform_16(%arg0: i32) -> (i32, i32) {
    %c0_i32 = arith.constant 0 : i32
    %c0_i32_0 = arith.constant 0 : i32
    return %arg0, %c0_i32 : i32, i32
  }
  func.func @transform_17(%arg0: i32) -> (i32, i32) {
    %c0_i32 = arith.constant 0 : i32
    %c0_i32_0 = arith.constant 0 : i32
    return %arg0, %c0_i32 : i32, i32
  }
}

</mosaic_0001>

<bundles_post_ra>
// kernel: tpu_custom_call.1
= control target key start
LH: loop header
LB: loop body
LE: loop exit
PB: predicated region body
PF: predicated region fallthrough
CT: control target
= control target key end

     0   :  { %s2211_s0 = inlined_call_operand.vmem [shape: f32[8,32], index: 0, kind: input, shape index: {}]   ;;  %s2212_s1 = inlined_call_operand.vmem [shape: f32[16,32], index: 1, kind: input, shape index: {}]   ;;  %s2213_s2 = inlined_call_operand.vmem [shape: f32[16,32], index: 2, kind: input, shape index: {}]   ;;  %s2214_s3 = inlined_call_operand.vmem [shape: f32[4,32], index: 3, kind: input, shape index: {}]   ;;  %s2215_s4 = inlined_call_operand.vmem [shape: f32[1,32], index: 4, kind: input, shape index: {}]   ;;  %s2216_s5 = inlined_call_operand.vmem [shape: f32[1,32], index: 5, kind: input, shape index: {}]   ;;  %s2217_s6 = inlined_call_operand.vmem [shape: f32[32,96], index: 6, kind: input, shape index: {}]   ;;  %s2218_s7 = inlined_call_operand.vmem [shape: f32[1,96], index: 7, kind: input, shape index: {}]   ;;  %s2219_s8 = inlined_call_operand.vmem [shape: f32[32,128], index: 8, kind: input, shape index: {}]   ;;  %s2220_s9 = inlined_call_operand.vmem [shape: f32[1,128], index: 9, kind: input, shape index: {}]   ;;  %s2221_s10 = inlined_call_operand.vmem [shape: f32[128,32], index: 10, kind: input, shape index: {}]   ;;  %s2222_s11 = inlined_call_operand.vmem [shape: f32[1,32], index: 11, kind: input, shape index: {}]   ;;  %s2223_s12 = inlined_call_operand.vmem [shape: f32[1,32], index: 12, kind: input, shape index: {}]   ;;  %s2224_s13 = inlined_call_operand.vmem [shape: f32[1,32], index: 13, kind: input, shape index: {}]   ;;  %s2225_s14 = inlined_call_operand.vmem [shape: f32[32,128], index: 14, kind: input, shape index: {}]   ;;  %s2226_s15 = inlined_call_operand.vmem [shape: f32[1,128], index: 15, kind: input, shape index: {}]   ;;  %s2227_s16 = inlined_call_operand.hbm [shape: f32[16,128], index: 16, kind: output, shape index: {0}]   ;;  %s2228_s17 = inlined_call_operand.hbm [shape: f32[8,32], index: 17, kind: output, shape index: {1}]  }
   0x1   :  { %2230 = sst [smem:[#allocation8_spill]] %s2211_s0 }
   0x2   :  { %2231 = sst [smem:[#allocation9_spill]] %s2212_s1 }
   0x3   :  { %23 = vsyncpa [#allocation3], 0  ;;  %s2232_s26 = sld [smem:[#allocation8_spill]]  ;;  %vm60_vm0 = vcmask 261120  }
   0x9   :  { %v57_v0 = vld [vmem:[%s2232_s26] sm:$0xff] }
   0xa   :  { %v61_v1 = vsel %vm60_vm0, %v57_v0, 0.0 }
   0xb   :  { %62 = vadd.xlane.f32.xlu0 %v61_v1 }
   0xc   :  { %24 = vsyncpa [#allocation5], 0  ;;  %v1699_v2 = vmov 32.0   ;;  %v111_v14 = vld [vmem:[%s2217_s6 + $0x18] sm:$0xff]  ;;  %v110_v15 = vld [vmem:[%s2217_s6 + $0x10] sm:$0xff]  ;;  %vm105_vm5 = vcmask 1043456  }
   0xd   :  { %1583 = vrcp.f32 %v1699_v2  ;;  %134 = vmatpush.msra.mxu0 %v111_v14  ;;  %v109_v16 = vld [vmem:[%s2217_s6 + $0x8] sm:$0xff]  ;;  %v108_v17 = vld [vmem:[%s2217_s6] sm:$0xff]  ;;  %vm149_vm6 = vcmask 64512   ;;  %s1700_s27 = smov 112   ;;  %s1701_s28 = smov 120   ;;  %vm671_vm7 = vcmask 130048  }
   0xe   :  { %v1575_v27 = vld [vmem:[%s2215_s4] ss:$0 sm:$0xff]  ;;  %s1702_s29 = smov 96   ;;  %s1704_s18 = smov 80   ;;  %vm673_vm8 = vcmask 195584  }
   0xf   :  { %135 = vmatpush.msra.mxu0 %v110_v15  ;;  %v98_v29 = vld [vmem:[%s2214_s3] sm:$0xf]  ;;  %s1705_s19 = smov 104   ;;  %s1706_s1 = smov 48  }
  0x10   :  { %v1576_v31 = vld [vmem:[%s2216_s5] ss:$0 sm:$0xff]  ;;  %v100_v33 = vrot.slane %v98_v29, 4  ;;  %s2233_s5 = sld [smem:[#allocation9_spill]]  ;;  %s1707_s20 = smov 72  }
  0x11   :  { %136 = vmatpush.msra.mxu0 %v109_v16  ;;  %v1577_v39 = vld [vmem:[%s2218_s7] ss:$0 sm:$0xff]  ;;  %s1703_s7 = smov 88   ;;  %s1708_s22 = smov 64  }
  0x12   :  { %v147_v45 = vld [vmem:[%s2213_s2] sm:$0xff]  ;;  %s1709_s23 = smov 56   ;;  %s1710_s24 = smov 40  }
  0x13   :  { %v1584_v3 = vpop.eup %1583  ;;  %137 = vmatpush.msra.mxu0 %v108_v17  ;;  %s1713_s25 = smov 24   ;;  %s1487_s21 = sshll.u32 %s2228_s17, 4  ;;  %s1488_s21 = int_to_ptr.hbm [resolvable:$true] %s1487_s21 }
  0x14   :  { %v65_v4 = vmul.f32 32.0, %v1584_v3  ;;  %vm69_vm1 = vweird.f32 %v1584_v3  ;;  %s1716_s17 = smov 128  }
  0x16   :  { %v66_v5 = vsub.f32 1.0, %v65_v4  ;;  %v145_v38 = vld [vmem:[%s2233_s5] sm:$0xff]  ;;  %v1860_v42 = vld [vmem:[%s2233_s5 + $0x8] sm:$0xff]  ;;  %s1712_s5 = smov 16  }
  0x17   :  { %1503 = vmatpush.xpose.msk.msra.mxu3 %vm149_vm6, %v145_v38 }
  0x18   :  { %v67_v6 = vmul.f32 %v1584_v3, %v66_v5 }
  0x1a   :  { %v68_v7 = vadd.f32 %v1584_v3, %v67_v6 }
  0x1c   :  { %v1811_v8 = vsel %vm69_vm1, %v1584_v3, %v68_v7 }
  0x7e   :  { %v63_v9 = vpop.xlane.xlu0 %62 }
  0x7f   :  { %v71_v10 = vmul.f32 %v1811_v8, %v63_v9 }
  0x81   :  { %v72_v11 = vsub.f32 %v57_v0, %v71_v10 }
  0x83   :  { %v73_v12 = vmul.f32 %v72_v11, %v72_v11 }
  0x85   :  { %v74_v13 = vsel %vm60_vm0, %v73_v12, 0.0 }
  0x86   :  { %75 = vadd.xlane.f32.xlu0 %v74_v13 }
  0xf9   :  { %v76_v18 = vpop.xlane.xlu0 %75 }
  0xfa   :  { %v77_v19 = vmul.f32 %v76_v18, %v1811_v8 }
  0xfc   :  { %v78_v20 = vadd.f32 1e-05, %v77_v19 }
  0xfe   :  { %1585 = vrsqrt.f32 %v78_v20  ;;  %vm85_vm3 = vweird.f32 %v78_v20 }
 0x104   :  { %v1586_v21 = vpop.eup %1585 }
 0x105   :  { %v80_v22 = vmul.f32 %v1586_v21, %v78_v20  ;;  %vm86_vm2 = vweird.f32 %v1586_v21 }
 0x106   :  { %vm87_vm4 = vmor %vm85_vm3, %vm86_vm2 }
 0x107   :  { %v81_v23 = vmul.f32 %v1586_v21, %v80_v22 }
 0x109   :  { %v82_v24 = vmul.f32 0.5, %v81_v23 }
 0x10b   :  { %v83_v25 = vsub.f32 1.5, %v82_v24 }
 0x10d   :  { %v84_v26 = vmul.f32 %v1586_v21, %v83_v25 }
 0x10f   :  { %v88_v28 = vsel %vm87_vm4, %v1586_v21, %v84_v26 }
 0x110   :  { %v89_v30 = vmul.f32 %v88_v28, %v72_v11 }
 0x112   :  { %v93_v32 = vmul.f32 %v1575_v27, %v89_v30 }
 0x114   :  { %v97_v34 = vadd.f32 %v1576_v31, %v93_v32 }
 0x116   :  { %v1838_v35 = vsel %vm105_vm5, %v97_v34, %v100_v33  ;;  %v103_v36 = vrot.slane %v97_v34, 4 }
 0x117   :  { %1501 = vmatmul.msk.f32.vlgmr.msra.gmra.mxu0 %vm60_vm0, %v1838_v35 }
 0x118   :  { %v1843_v37 = vsel %vm105_vm5, %v103_v36, %v100_v33 }
 0x11f   :  { %1502 = vmatmul.msk.f32.gmra.mxu0 %vm60_vm0, %v1843_v37 }
 0x194   :  { %v139_v40 = vpop.f32.mrf.mxu0 }
 0x195   :  { %v140_v41 = vadd.f32 %v1577_v39, %v139_v40 }
 0x197   :  { %402 = vrot.lane.b32.xlu0 %v140_v41, %s1700_s27  ;;  %273 = vrot.lane.b32.xlu2 %v140_v41, %s1701_s28 }
 0x198   :  { %177 = vrot.lane.b32.xlu1 %v140_v41, %s1702_s29  ;;  %1504 = vmatmul.msk.f32.vlgmr.msra.gmra.mxu3 %vm149_vm6, %v140_v41 }
 0x19c   :  { %v142_v43 = vpop.f32.mrf.mxu0 }
 0x19d   :  { %v1872_v44 = vadd.f32 %v1577_v39, %v142_v43 }
 0x19f   :  { %800 = vrot.lane.b32.xlu0 %v1860_v42, %s1701_s28  ;;  %404 = vrot.lane.b32.xlu2 %v145_v38, %s1700_s27 }
 0x1a0   :  { %302 = vrot.lane.b32.xlu1 %v140_v41, %s1703_s7 }
 0x1a7   :  { %929 = vrot.lane.b32.xlu0 %v1860_v42, %s1700_s27  ;;  %431 = vrot.lane.b32.xlu2 %v140_v41, %s1704_s18 }
 0x1a8   :  { %275 = vrot.lane.b32.xlu1 %v145_v38, %s1701_s28 }
 0x1af   :  { %1057 = vrot.lane.b32.xlu0 %v1860_v42, %s1705_s19  ;;  %530 = vrot.lane.b32.xlu2 %v140_v41, %s1705_s19 }
 0x1b0   :  { %532 = vrot.lane.b32.xlu1 %v145_v38, %s1705_s19  ;;  %v1970_v38 = vld [vmem:[%s2213_s2 + $0x8] sm:$0xff]  ;;  %s1711_s2 = smov 8  }
 0x1b7   :  { %477 = vrot.lane.b32.xlu0 %v140_v41, %s1706_s1  ;;  %702 = vrot.lane.b32.xlu2 %v1872_v44, %s1702_s29 }
 0x1b8   :  { %559 = vrot.lane.b32.xlu1 %v140_v41, %s1707_s20 }
 0x1bf   :  { %827 = vrot.lane.b32.xlu2 %v1872_v44, %s1703_s7 }
 0x1c0   :  { %798 = vrot.lane.b32.xlu1 %v1872_v44, %s1701_s28 }
 0x1c7   :  { %956 = vrot.lane.b32.xlu2 %v1872_v44, %s1704_s18 }
 0x1c8   :  { %927 = vrot.lane.b32.xlu1 %v1872_v44, %s1700_s27 }
 0x1cf   :  { %1084 = vrot.lane.b32.xlu2 %v1872_v44, %s1707_s20 }
 0x1d0   :  { %1055 = vrot.lane.b32.xlu1 %v1872_v44, %s1705_s19 }
 0x1d7   :  { %223 = vrot.lane.b32.xlu2 %v140_v41, %s1708_s22 }
 0x1d8   :  { %375 = vrot.lane.b32.xlu1 %v147_v45, %s1701_s28 }
 0x1df   :  { %348 = vrot.lane.b32.xlu2 %v140_v41, %s1709_s23 }
 0x1e0   :  { %503 = vrot.lane.b32.xlu1 %v147_v45, %s1700_s27 }
 0x1e7   :  { %631 = vrot.lane.b32.xlu2 %v147_v45, %s1705_s19 }
 0x1e8   :  { %605 = vrot.lane.b32.xlu1 %v140_v41, %s1710_s24 }
 0x1f1   :  { %v274_v46 = vpop.permute.xlu2 %273 }
 0x1f9   :  { %v405_v47 = vpop.permute.xlu2 %404 }
 0x201   :  { %v432_v48 = vpop.permute.xlu2 %431 }
 0x209   :  { %v531_v49 = vpop.permute.xlu2 %530  ;;  %v403_v57 = vpop.permute.xlu0 %402 }
 0x20a   :  { %v178_v50 = vpop.permute.xlu1 %177 }
 0x20b   :  { %1505 = vmatpush.xpose.msk.msra.mxu2 %vm149_vm6, %v178_v50 }
 0x20e   :  { %1506 = vmatmul.msk.f32.vlgmr.msra.gmra.mxu2 %vm149_vm6, %v140_v41 }
 0x211   :  { %v703_v51 = vpop.permute.xlu2 %702  ;;  %v801_v62 = vpop.permute.xlu0 %800 }
 0x212   :  { %v303_v52 = vpop.permute.xlu1 %302 }
 0x213   :  { %1511 = vmatpush.xpose.msk.msrb.mxu2 %vm149_vm6, %v303_v52 }
 0x216   :  { %1512 = vmatmul.msk.f32.vlgmr.msrb.gmra.mxu2 %vm149_vm6, %v274_v46 }
 0x217   :  { %1515 = vmatpush.xpose.msk.msra.mxu2 %vm149_vm6, %v405_v47 }
 0x219   :  { %v828_v53 = vpop.permute.xlu2 %827  ;;  %v930_v2 = vpop.permute.xlu0 %929 }
 0x21a   :  { %v276_v54 = vpop.permute.xlu1 %275 }
 0x21b   :  { %1517 = vmatpush.xpose.msk.msrb.mxu2 %vm149_vm6, %v432_v48  ;;  %v173_v55 = vpop.f32.mrf.mxu3  ;;  %1509 = vmatpush.xpose.msk.msra.mxu1 %vm149_vm6, %v276_v54 }
 0x21c   :  { %v1901_v56 = vmul.f32 0.35355338, %v173_v55 }
 0x21e   :  { %1510 = vmatmul.msk.f32.vlgmr.msra.gmra.mxu1 %vm149_vm6, %v274_v46  ;;  %1516 = vmatmul.msk.f32.vlgmr.msra.gmra.mxu2 %vm149_vm6, %v403_v57  ;;  %v202_v58 = vsel %vm149_vm6, %v1901_v56, -inf }
 0x21f   :  { %203 = vmax.xlane.f32.xlu0 %v202_v58 }
 0x221   :  { %v957_v59 = vpop.permute.xlu2 %956  ;;  %v1058_v4 = vpop.permute.xlu0 %1057 }
 0x222   :  { %v533_v60 = vpop.permute.xlu1 %532 }
 0x223   :  { %1521 = vmatpush.xpose.msk.msra.mxu2 %vm149_vm6, %v533_v60 }
 0x226   :  { %1518 = vmatmul.msk.f32.vlgmr.msrb.gmra.mxu2 %vm149_vm6, %v403_v57 }
 0x227   :  { %1527 = vmatpush.xpose.msk.msrb.mxu2 %vm149_vm6, %v1860_v42 }
 0x229   :  { %v1085_v61 = vpop.permute.xlu2 %1084  ;;  %v478_v46 = vpop.permute.xlu0 %477 }
 0x22a   :  { %v560_v63 = vpop.permute.xlu1 %559 }
 0x22b   :  { %1523 = vmatpush.xpose.msk.msrb.mxu0 %vm149_vm6, %v560_v63 }
 0x22e   :  { %1522 = vmatmul.msk.f32.vlgmr.msra.gmra.mxu2 %vm149_vm6, %v531_v49  ;;  %1524 = vmatmul.msk.f32.vlgmr.msrb.gmra.mxu0 %vm149_vm6, %v531_v49 }
 0x22f   :  { %1529 = vmatpush.xpose.msk.msra.mxu0 %vm149_vm6, %v703_v51  ;;  %1533 = vmatpush.xpose.msk.msra.mxu2 %vm149_vm6, %v801_v62 }
 0x231   :  { %v224_v0 = vpop.permute.xlu2 %223 }
 0x232   :  { %v799_v1 = vpop.permute.xlu1 %798  ;;  %244 = vmatpush.msrb.mxu3 %v224_v0 }
 0x233   :  { %1535 = vmatpush.xpose.msk.msrb.mxu0 %vm149_vm6, %v828_v53 }
 0x234   :  { %267 = vmatpush.msra.mxu3 %v147_v45 }
 0x236   :  { %1528 = vmatmul.msk.f32.vlgmr.msrb.gmra.mxu2 %vm149_vm6, %v1872_v44  ;;  %1530 = vmatmul.msk.f32.vlgmr.msra.gmra.mxu0 %vm149_vm6, %v1872_v44 }
 0x237   :  { %1541 = vmatpush.xpose.msk.msra.mxu0 %vm149_vm6, %v957_v59  ;;  %1539 = vmatpush.xpose.msk.msrb.mxu2 %vm149_vm6, %v930_v2 }
 0x23a   :  { %v928_v3 = vpop.permute.xlu1 %927 }
 0x23e   :  { %1534 = vmatmul.msk.f32.vlgmr.msra.gmra.mxu2 %vm149_vm6, %v799_v1  ;;  %1536 = vmatmul.msk.f32.vlgmr.msrb.gmra.mxu0 %vm149_vm6, %v799_v1 }
 0x23f   :  { %1547 = vmatpush.xpose.msk.msrb.mxu0 %vm149_vm6, %v1085_v61  ;;  %1545 = vmatpush.xpose.msk.msra.mxu2 %vm149_vm6, %v1058_v4 }
 0x242   :  { %v1056_v5 = vpop.permute.xlu1 %1055 }
 0x246   :  { %1540 = vmatmul.msk.f32.vlgmr.msrb.gmra.mxu2 %vm149_vm6, %v928_v3  ;;  %1542 = vmatmul.msk.f32.vlgmr.msra.gmra.mxu0 %vm149_vm6, %v928_v3 }
 0x24a   :  { %v376_v6 = vpop.permute.xlu1 %375 }
 0x24b   :  { %396 = vmatpush.msrb.mxu1 %v376_v6 }
 0x24e   :  { %1546 = vmatmul.msk.f32.vlgmr.msra.gmra.mxu2 %vm149_vm6, %v1056_v5  ;;  %1548 = vmatmul.msk.f32.vlgmr.msrb.gmra.mxu0 %vm149_vm6, %v1056_v5  ;;  %v349_v5 = vpop.permute.xlu2 %348 }
 0x252   :  { %v504_v7 = vpop.permute.xlu1 %503 }
 0x253   :  { %524 = vmatpush.msra.mxu1 %v504_v7 }
 0x256   :  { %v632_v7 = vpop.permute.xlu2 %631 }
 0x25a   :  { %v1988_v49 = vpop.permute.xlu1 %605 }
 0x291   :  { %v198_v9 = vpop.f32.mrf.mxu2 }
 0x292   :  { %v1931_v10 = vmul.f32 0.35355338, %v198_v9  ;;  %v204_v55 = vpop.xlane.xlu0 %203 }
 0x294   :  { %v205_v11 = vsel %vm149_vm6, %v1931_v10, -inf }
 0x295   :  { %206 = vmax.xlane.f32.xlu1 %v205_v11 }
 0x299   :  { %v323_v12 = vpop.f32.mrf.mxu2 }
 0x29a   :  { %v1955_v29 = vmul.f32 0.35355338, %v323_v12 }
 0x29b   :  { %v298_v13 = vpop.f32.mrf.mxu1 }
 0x29c   :  { %v1935_v14 = vmul.f32 0.35355338, %v298_v13  ;;  %v330_v32 = vsel %vm149_vm6, %v1955_v29, -inf }
 0x29e   :  { %v327_v15 = vsel %vm149_vm6, %v1935_v14, -inf }
 0x29f   :  { %328 = vmax.xlane.f32.xlu2 %v327_v15 }
 0x2a1   :  { %v427_v16 = vpop.f32.mrf.mxu2 }
 0x2a2   :  { %v1939_v17 = vmul.f32 0.35355338, %v427_v16 }
 0x2a4   :  { %v456_v18 = vsel %vm149_vm6, %v1939_v17, -inf }
 0x2a5   :  { %457 = vmax.xlane.f32.xlu1 %v456_v18 }
 0x2a9   :  { %v452_v19 = vpop.f32.mrf.mxu2 }
 0x2aa   :  { %v1963_v34 = vmul.f32 0.35355338, %v452_v19 }
 0x2ab   :  { %v580_v20 = vpop.f32.mrf.mxu0 }
 0x2ac   :  { %v1943_v21 = vmul.f32 0.35355338, %v580_v20  ;;  %v459_v36 = vsel %vm149_vm6, %v1963_v34, -inf }
 0x2ae   :  { %v587_v22 = vsel %vm149_vm6, %v1943_v21, -inf }
 0x2af   :  { %588 = vmax.xlane.f32.xlu0 %v587_v22 }
 0x2b1   :  { %v555_v23 = vpop.f32.mrf.mxu2 }
 0x2b2   :  { %v1947_v24 = vmul.f32 0.35355338, %v555_v23 }
 0x2b3   :  { %v723_v25 = vpop.f32.mrf.mxu0 }
 0x2b4   :  { %v1949_v26 = vmul.f32 0.35355338, %v723_v25  ;;  %v584_v27 = vsel %vm149_vm6, %v1947_v24, -inf }
 0x2b5   :  { %585 = vmax.xlane.f32.xlu1 %v584_v27 }
 0x2b6   :  { %v730_v28 = vsel %vm149_vm6, %v1949_v26, -inf }
 0x2b7   :  { %731 = vmax.xlane.f32.xlu0 %v730_v28 }
 0x2b9   :  { %v698_v39 = vpop.f32.mrf.mxu2 }
 0x2ba   :  { %v1980_v42 = vmul.f32 0.35355338, %v698_v39 }
 0x2bb   :  { %v848_v30 = vpop.f32.mrf.mxu0 }
 0x2bc   :  { %v1957_v31 = vmul.f32 0.35355338, %v848_v30  ;;  %v727_v48 = vsel %vm149_vm6, %v1980_v42, -inf }
 0x2be   :  { %v855_v33 = vsel %vm149_vm6, %v1957_v31, -inf }
 0x2bf   :  { %331 = vmax.xlane.f32.xlu0 %v330_v32  ;;  %856 = vmax.xlane.f32.xlu2 %v855_v33 }
 0x2c1   :  { %v823_v40 = vpop.f32.mrf.mxu2 }
 0x2c2   :  { %v1982_v43 = vmul.f32 0.35355338, %v823_v40 }
 0x2c3   :  { %v977_v41 = vpop.f32.mrf.mxu0 }
 0x2c4   :  { %v852_v47 = vsel %vm149_vm6, %v1982_v43, -inf  ;;  %v1990_v50 = vmul.f32 0.35355338, %v977_v41 }
 0x2c6   :  { %v984_v54 = vsel %vm149_vm6, %v1990_v50, -inf }
 0x2c7   :  { %460 = vmax.xlane.f32.xlu0 %v459_v36 }
 0x2c9   :  { %v952_v45 = vpop.f32.mrf.mxu2 }
 0x2ca   :  { %v1992_v52 = vmul.f32 0.35355338, %v952_v45 }
 0x2cb   :  { %v1105_v51 = vpop.f32.mrf.mxu0 }
 0x2cc   :  { %v1994_v53 = vmul.f32 0.35355338, %v1105_v51  ;;  %v981_v57 = vsel %vm149_vm6, %v1992_v52, -inf }
 0x2ce   :  { %900 = vrot.lane.b32.xlu1 %v1970_v38, %s1701_s28  ;;  %v1112_v58 = vsel %vm149_vm6, %v1994_v53, -inf }
 0x2d1   :  { %v1080_v59 = vpop.f32.mrf.mxu2 }
 0x2d2   :  { %v2002_v62 = vmul.f32 0.35355338, %v1080_v59 }
 0x2d4   :  { %v1109_v1 = vsel %vm149_vm6, %v2002_v62, -inf }
 0x2d6   :  { %1002 = vrot.lane.b32.xlu1 %v1872_v44, %s1706_s1 }
 0x2d7   :  { %873 = vrot.lane.b32.xlu2 %v1872_v44, %s1709_s23  ;;  %s1715_s23 = smov [#allocation2]  }
 0x2db   :  { %748 = vrot.lane.b32.xlu0 %v1872_v44, %s1708_s22 }
 0x300   :  { %853 = vmax.xlane.f32.xlu1 %v852_v47  ;;  %728 = vmax.xlane.f32.xlu2 %v727_v48 }
 0x305   :  { %985 = vmax.xlane.f32.xlu0 %v984_v54 }
 0x308   :  { %v207_v60 = vpop.xlane.xlu1 %206  ;;  %982 = vmax.xlane.f32.xlu1 %v981_v57  ;;  %1113 = vmax.xlane.f32.xlu2 %v1112_v58 }
 0x309   :  { %v208_v61 = vmax.f32 %v204_v55, %v207_v60 }
 0x30b   :  { %v212_v63 = vsub.f32 %v1931_v10, %v208_v61  ;;  %v209_v2 = vsub.f32 %v1901_v56, %v208_v61 }
 0x30d   :  { %v213_v0 = vmul.f32 1.442695, %v212_v63  ;;  %v210_v3 = vmul.f32 1.442695, %v209_v2 }
 0x30f   :  { %1587 = vpow2.f32 %v213_v0 }
 0x310   :  { %1110 = vmax.xlane.f32.xlu1 %v1109_v1  ;;  %1589 = vpow2.f32 %v210_v3 }
 0x312   :  { %v329_v10 = vpop.xlane.xlu2 %328 }
 0x315   :  { %v2008_v4 = vpop.eup %1587 }
 0x316   :  { %1507 = vmatmul.msk.f32.vlgmr.msrb.gmra.mxu3 %vm149_vm6, %v2008_v4  ;;  %v1590_v6 = vpop.eup %1589  ;;  %v218_v54 = vsel %vm149_vm6, %v2008_v4, 0.0 }
 0x317   :  { %369 = vmatpush.msrb.mxu3 %v349_v5 }
 0x318   :  { %v458_v11 = vpop.xlane.xlu1 %457 }
 0x319   :  { %1028 = vrot.lane.b32.xlu0 %v1970_v38, %s1700_s27 }
 0x31e   :  { %1508 = vmatmul.msk.f32.vlgmr.msra.gmra.mxu3 %vm149_vm6, %v1590_v6 }
 0x31f   :  { %498 = vmatpush.msra.mxu3 %v478_v46 }
 0x320   :  { %1156 = vrot.lane.b32.xlu2 %v1970_v38, %s1705_s19 }
 0x322   :  { %v589_v56 = vpop.xlane.xlu0 %588 }
 0x328   :  { %v586_v20 = vpop.xlane.xlu1 %585 }
 0x329   :  { %1130 = vrot.lane.b32.xlu1 %v1872_v44, %s1710_s24  ;;  %v590_v25 = vmax.f32 %v586_v20, %v589_v56  ;;  %s1471_s24 = sshll.u32 %s1715_s23, 4  ;;  %s1472_s24 = int_to_ptr.vmem [resolvable:$true] %s1471_s24 }
 0x32a   :  { %v2019_v9 = vpop.xlane.xlu0 %731 }
 0x332   :  { %v332_v12 = vpop.xlane.xlu0 %331  ;;  %v857_v40 = vpop.xlane.xlu2 %856 }
 0x333   :  { %v333_v13 = vmax.f32 %v329_v10, %v332_v12 }
 0x335   :  { %v334_v15 = vsub.f32 %v1935_v14, %v333_v13  ;;  %v337_v16 = vsub.f32 %v1955_v29, %v333_v13  ;;  %v591_v14 = vsub.f32 %v1947_v24, %v590_v25  ;;  %v594_v29 = vsub.f32 %v1943_v21, %v590_v25 }
 0x337   :  { %v335_v18 = vmul.f32 1.442695, %v334_v15  ;;  %v338_v19 = vmul.f32 1.442695, %v337_v16  ;;  %v595_v36 = vmul.f32 1.442695, %v594_v29 }
 0x339   :  { %1591 = vpow2.f32 %v335_v18 }
 0x33a   :  { %1593 = vpow2.f32 %v338_v19  ;;  %v461_v22 = vpop.xlane.xlu0 %460 }
 0x33b   :  { %v462_v23 = vmax.f32 %v458_v11, %v461_v22 }
 0x33d   :  { %v463_v44 = vsub.f32 %v1939_v17, %v462_v23  ;;  %v466_v27 = vsub.f32 %v1963_v34, %v462_v23  ;;  %v215_v17 = vsel %vm149_vm6, %v1590_v6, 0.0  ;;  %v592_v34 = vmul.f32 1.442695, %v591_v14 }
 0x33f   :  { %v1592_v28 = vpop.eup %1591  ;;  %v464_v30 = vmul.f32 1.442695, %v463_v44  ;;  %v467_v32 = vmul.f32 1.442695, %v466_v27 }
 0x340   :  { %v1594_v33 = vpop.eup %1593  ;;  %1514 = vmatmul.msk.f32.vlgmr.msrb.gmra.mxu1 %vm149_vm6, %v1592_v28  ;;  %v901_v48 = vpop.permute.xlu1 %900 }
 0x341   :  { %1595 = vpow2.f32 %v464_v30  ;;  %1513 = vmatmul.msk.f32.vlgmr.msrb.gmra.mxu3 %vm149_vm6, %v1594_v33  ;;  %652 = vmatpush.msrb.mxu1 %v632_v7  ;;  %v343_v21 = vsel %vm149_vm6, %v1594_v33, 0.0 }
 0x342   :  { %1597 = vpow2.f32 %v467_v32  ;;  %626 = vmatpush.msrb.mxu3 %v1988_v49  ;;  %v874_v49 = vpop.permute.xlu2 %873 }
 0x343   :  { %216 = vadd.xlane.f32.xlu0 %v215_v17  ;;  %1599 = vpow2.f32 %v592_v34 }
 0x344   :  { %1601 = vpow2.f32 %v595_v36 }
 0x347   :  { %v1596_v39 = vpop.eup %1595 }
 0x348   :  { %v1598_v41 = vpop.eup %1597  ;;  %1520 = vmatmul.msk.f32.vlgmr.msra.gmra.mxu1 %vm149_vm6, %v1596_v39  ;;  %v469_v24 = vsel %vm149_vm6, %v1596_v39, 0.0  ;;  %v1003_v58 = vpop.permute.xlu1 %1002 }
 0x349   :  { %1519 = vmatmul.msk.f32.vlgmr.msra.gmra.mxu3 %vm149_vm6, %v1598_v41  ;;  %470 = vadd.xlane.f32.xlu2 %v469_v24  ;;  %v1600_v46 = vpop.eup %1599  ;;  %v472_v55 = vsel %vm149_vm6, %v1598_v41, 0.0 }
 0x34a   :  { %792 = vmatpush.msra.mxu1 %v1970_v38  ;;  %v1602_v47 = vpop.eup %1601  ;;  %v597_v51 = vsel %vm149_vm6, %v1600_v46, 0.0  ;;  %v340_v38 = vsel %vm149_vm6, %v1592_v28, 0.0 }
 0x34b   :  { %344 = vadd.xlane.f32.xlu0 %v343_v21  ;;  %v600_v57 = vsel %vm149_vm6, %v1602_v47, 0.0 }
 0x34d   :  { %v749_v45 = vpop.permute.xlu0 %748 }
 0x34e   :  { %769 = vmatpush.msra.mxu3 %v749_v45 }
 0x350   :  { %1526 = vmatmul.msk.f32.vlgmr.msrb.gmra.mxu1 %vm149_vm6, %v1600_v46 }
 0x351   :  { %1525 = vmatmul.msk.f32.vlgmr.msrb.gmra.mxu3 %vm149_vm6, %v1602_v47  ;;  %921 = vmatpush.msrb.mxu1 %v901_v48 }
 0x352   :  { %894 = vmatpush.msrb.mxu3 %v874_v49 }
 0x353   :  { %598 = vadd.xlane.f32.xlu0 %v597_v51  ;;  %219 = vadd.xlane.f32.xlu1 %v218_v54 }
 0x35b   :  { %341 = vadd.xlane.f32.xlu1 %v340_v38 }
 0x363   :  { %473 = vadd.xlane.f32.xlu1 %v472_v55 }
 0x36b   :  { %601 = vadd.xlane.f32.xlu1 %v600_v57 }
 0x373   :  { %v854_v59 = vpop.xlane.xlu1 %853  ;;  %v729_v60 = vpop.xlane.xlu2 %728 }
 0x374   :  { %v858_v61 = vmax.f32 %v854_v59, %v857_v40  ;;  %v733_v63 = vmax.f32 %v729_v60, %v2019_v9 }
 0x376   :  { %v859_v0 = vsub.f32 %v1982_v43, %v858_v61  ;;  %v862_v1 = vsub.f32 %v1957_v31, %v858_v61  ;;  %v734_v2 = vsub.f32 %v1980_v42, %v733_v63  ;;  %v737_v3 = vsub.f32 %v1949_v26, %v733_v63 }
 0x378   :  { %v860_v4 = vmul.f32 1.442695, %v859_v0  ;;  %v863_v5 = vmul.f32 1.442695, %v862_v1  ;;  %v735_v6 = vmul.f32 1.442695, %v734_v2  ;;  %v986_v7 = vpop.xlane.xlu0 %985 }
 0x379   :  { %v738_v56 = vmul.f32 1.442695, %v737_v3 }
 0x37a   :  { %1603 = vpow2.f32 %v860_v4 }
 0x37b   :  { %1605 = vpow2.f32 %v863_v5  ;;  %v983_v10 = vpop.xlane.xlu1 %982  ;;  %v1114_v16 = vpop.xlane.xlu2 %1113 }
 0x37c   :  { %1607 = vpow2.f32 %v735_v6  ;;  %v987_v11 = vmax.f32 %v983_v10, %v986_v7 }
 0x37d   :  { %1609 = vpow2.f32 %v738_v56 }
 0x37e   :  { %v988_v9 = vsub.f32 %v1992_v52, %v987_v11  ;;  %v991_v43 = vsub.f32 %v1990_v50, %v987_v11 }
 0x380   :  { %v1604_v31 = vpop.eup %1603  ;;  %v989_v12 = vmul.f32 1.442695, %v988_v9  ;;  %v992_v42 = vmul.f32 1.442695, %v991_v43 }
 0x381   :  { %v1606_v13 = vpop.eup %1605  ;;  %v865_v26 = vsel %vm149_vm6, %v1604_v31, 0.0 }
 0x382   :  { %v1608_v15 = vpop.eup %1607  ;;  %1611 = vpow2.f32 %v989_v12  ;;  %v868_v18 = vsel %vm149_vm6, %v1606_v13, 0.0  ;;  %866 = vadd.xlane.f32.xlu0 %v865_v26 }
 0x383   :  { %v1610_v19 = vpop.eup %1609  ;;  %1613 = vpow2.f32 %v992_v42  ;;  %1532 = vmatmul.msk.f32.vlgmr.msra.gmra.mxu1 %vm149_vm6, %v1608_v15  ;;  %869 = vadd.xlane.f32.xlu1 %v868_v18  ;;  %v1111_v52 = vpop.xlane.xlu1 %1110  ;;  %v740_v36 = vsel %vm149_vm6, %v1608_v15, 0.0 }
 0x384   :  { %1531 = vmatmul.msk.f32.vlgmr.msra.gmra.mxu3 %vm149_vm6, %v1610_v19  ;;  %v1115_v50 = vmax.f32 %v1111_v52, %v1114_v16  ;;  %v1157_v32 = vpop.permute.xlu2 %1156  ;;  %v743_v29 = vsel %vm149_vm6, %v1610_v19, 0.0 }
 0x385   :  { %1023 = vmatpush.msra.mxu3 %v1003_v58 }
 0x386   :  { %v1116_v20 = vsub.f32 %v2002_v62, %v1115_v50  ;;  %v1119_v22 = vsub.f32 %v1994_v53, %v1115_v50 }
 0x388   :  { %v1612_v23 = vpop.eup %1611  ;;  %v1117_v25 = vmul.f32 1.442695, %v1116_v20  ;;  %v1120_v44 = vmul.f32 1.442695, %v1119_v22 }
 0x389   :  { %v1614_v27 = vpop.eup %1613  ;;  %v994_v28 = vsel %vm149_vm6, %v1612_v23, 0.0 }
 0x38a   :  { %1615 = vpow2.f32 %v1117_v25  ;;  %v997_v30 = vsel %vm149_vm6, %v1614_v27, 0.0  ;;  %995 = vadd.xlane.f32.xlu2 %v994_v28 }
 0x38b   :  { %1617 = vpow2.f32 %v1120_v44  ;;  %1538 = vmatmul.msk.f32.vlgmr.msrb.gmra.mxu1 %vm149_vm6, %v1604_v31  ;;  %998 = vadd.xlane.f32.xlu0 %v997_v30  ;;  %v1029_v33 = vpop.permute.xlu0 %1028 }
 0x38c   :  { %1537 = vmatmul.msk.f32.vlgmr.msrb.gmra.mxu3 %vm149_vm6, %v1606_v13  ;;  %1049 = vmatpush.msra.mxu1 %v1029_v33 }
 0x38e   :  { %1177 = vmatpush.msrb.mxu1 %v1157_v32 }
 0x390   :  { %v1616_v53 = vpop.eup %1615 }
 0x391   :  { %v1618_v62 = vpop.eup %1617  ;;  %v1122_v14 = vsel %vm149_vm6, %v1616_v53, 0.0 }
 0x392   :  { %v1125_v17 = vsel %vm149_vm6, %v1618_v62, 0.0  ;;  %1123 = vadd.xlane.f32.xlu1 %v1122_v14 }
 0x393   :  { %1544 = vmatmul.msk.f32.vlgmr.msra.gmra.mxu1 %vm149_vm6, %v1612_v23  ;;  %744 = vadd.xlane.f32.xlu0 %v743_v29 }
 0x394   :  { %1543 = vmatmul.msk.f32.vlgmr.msra.gmra.mxu3 %vm149_vm6, %v1614_v27  ;;  %1126 = vadd.xlane.f32.xlu2 %v1125_v17 }
 0x399   :  { %v246_v34 = vpop.f32.mrf.mxu3 }
 0x39b   :  { %1550 = vmatmul.msk.f32.vlgmr.msrb.gmra.mxu1 %vm149_vm6, %v1616_v53  ;;  %v1131_v39 = vpop.permute.xlu1 %1130 }
 0x39c   :  { %741 = vadd.xlane.f32.xlu2 %v740_v36  ;;  %1151 = vmatpush.msrb.mxu3 %v1131_v39  ;;  %v1200_v36 = vld [vmem:[%s2219_s8 + $0x10] sm:$0xff]  ;;  %v1199_v39 = vld [vmem:[%s2219_s8 + $0x8] sm:$0xff] }
 0x39d   :  { %1549 = vmatmul.msk.f32.vlgmr.msrb.gmra.mxu3 %vm149_vm6, %v1618_v62 }
 0x3a1   :  { %v269_v40 = vpop.f32.mrf.mxu3 }
 0x3a2   :  { %v270_v41 = vadd.f32 %v269_v40, %v246_v34  ;;  %v1201_v34 = vld [vmem:[%s2219_s8 + $0x18] sm:$0xff]  ;;  %v1198_v40 = vld [vmem:[%s2219_s8] sm:$0xff] }
 0x3a3   :  { %1224 = vmatpush.msrb.mxu2 %v1201_v34  ;;  %1370 = vmatpush.msra.mxu3 %v1201_v34 }
 0x3a5   :  { %1225 = vmatpush.msrb.mxu2 %v1200_v36  ;;  %1371 = vmatpush.msra.mxu3 %v1200_v36 }
 0x3a7   :  { %1226 = vmatpush.msrb.mxu2 %v1199_v39  ;;  %1372 = vmatpush.msra.mxu3 %v1199_v39 }
 0x3a9   :  { %1227 = vmatpush.msrb.mxu2 %v1198_v40  ;;  %1373 = vmatpush.msra.mxu3 %v1198_v40 }
 0x3b6   :  { %v217_v24 = vpop.xlane.xlu0 %216 }
 0x3bc   :  { %v471_v55 = vpop.xlane.xlu2 %470 }
 0x3bd   :  { %v398_v38 = vpop.f32.mrf.mxu1 }
 0x3be   :  { %v345_v46 = vpop.xlane.xlu0 %344 }
 0x3c4   :  { %v371_v49 = vpop.f32.mrf.mxu3 }
 0x3c5   :  { %v399_v57 = vadd.f32 %v398_v38, %v371_v49  ;;  %v526_v0 = vpop.f32.mrf.mxu1  ;;  %v1267_v38 = vld [vmem:[%s2221_s10 + $0x70] sm:$0xff] }
 0x3c6   :  { %v220_v21 = vpop.xlane.xlu1 %219  ;;  %v599_v1 = vpop.xlane.xlu0 %598 }
 0x3c7   :  { %v221_v45 = vadd.f32 %v220_v21, %v217_v24 }
 0x3c9   :  { %1619 = vrcp.f32 %v221_v45 }
 0x3cc   :  { %v500_v63 = vpop.f32.mrf.mxu3 }
 0x3cd   :  { %v527_v2 = vadd.f32 %v526_v0, %v500_v63  ;;  %v654_v7 = vpop.f32.mrf.mxu1 }
 0x3ce   :  { %v342_v47 = vpop.xlane.xlu1 %341 }
 0x3cf   :  { %v1620_v48 = vpop.eup %1619  ;;  %v346_v51 = vadd.f32 %v345_v46, %v342_v47 }
 0x3d0   :  { %v2069_v54 = vmul.f32 %v1620_v48, %v270_v41 }
 0x3d1   :  { %1621 = vrcp.f32 %v346_v51  ;;  %v1268_v51 = vld [vmem:[%s2221_s10 + $0x78] sm:$0xff] }
 0x3d2   :  { %1273 = vmatpush.msra.mxu0 %v1268_v51  ;;  %1399 = vmatpush.msra.mxu1 %v1268_v51 }
 0x3d4   :  { %v628_v56 = vpop.f32.mrf.mxu3  ;;  %1274 = vmatpush.msra.mxu0 %v1267_v38  ;;  %1400 = vmatpush.msra.mxu1 %v1267_v38 }
 0x3d5   :  { %v655_v10 = vadd.f32 %v654_v7, %v628_v56  ;;  %v1260_v56 = vld [vmem:[%s2221_s10 + $0x38] sm:$0xff]  ;;  %v1259_v7 = vld [vmem:[%s2221_s10 + $0x30] sm:$0xff] }
 0x3d6   :  { %v474_v58 = vpop.xlane.xlu1 %473 }
 0x3d7   :  { %v1622_v59 = vpop.eup %1621  ;;  %v475_v60 = vadd.f32 %v474_v58, %v471_v55  ;;  %v1265_v55 = vld [vmem:[%s2221_s10 + $0x60] sm:$0xff] }
 0x3d8   :  { %v401_v61 = vmul.f32 %v1622_v59, %v399_v57 }
 0x3d9   :  { %1623 = vrcp.f32 %v475_v60 }
 0x3da   :  { %659 = vrot.lane.b32.xlu1 %v401_v61, %s1711_s2 }
 0x3de   :  { %v602_v3 = vpop.xlane.xlu1 %601 }
 0x3df   :  { %v1624_v4 = vpop.eup %1623  ;;  %v603_v5 = vadd.f32 %v602_v3, %v599_v1  ;;  %v1264_v3 = vld [vmem:[%s2221_s10 + $0x58] sm:$0xff] }
 0x3e0   :  { %v529_v6 = vmul.f32 %v1624_v4, %v527_v2  ;;  %v1263_v4 = vld [vmem:[%s2221_s10 + $0x50] sm:$0xff] }
 0x3e1   :  { %1625 = vrcp.f32 %v603_v5  ;;  %v1262_v5 = vld [vmem:[%s2221_s10 + $0x48] sm:$0xff] }
 0x3e2   :  { %663 = vrot.lane.b32.xlu2 %v529_v6, %s1712_s5  ;;  %v1261_v6 = vld [vmem:[%s2221_s10 + $0x40] sm:$0xff] }
 0x3e7   :  { %v1626_v11 = vpop.eup %1625 }
 0x3e8   :  { %v657_v9 = vmul.f32 %v1626_v11, %v655_v10  ;;  %v1258_v10 = vld [vmem:[%s2221_s10 + $0x28] sm:$0xff]  ;;  %v1257_v11 = vld [vmem:[%s2221_s10 + $0x20] sm:$0xff] }
 0x3ea   :  { %667 = vrot.lane.b32.xlu0 %v657_v9, %s1713_s25  ;;  %v1256_v9 = vld [vmem:[%s2221_s10 + $0x18] sm:$0xff] }
 0x3f5   :  { %v867_v43 = vpop.xlane.xlu0 %866 }
 0x3f6   :  { %v870_v12 = vpop.xlane.xlu1 %869 }
 0x3f7   :  { %v871_v42 = vadd.f32 %v870_v12, %v867_v43  ;;  %v1255_v43 = vld [vmem:[%s2221_s10 + $0x10] sm:$0xff]  ;;  %v1253_v12 = vld [vmem:[%s2221_s10] sm:$0xff] }
 0x3f9   :  { %1627 = vrcp.f32 %v871_v42  ;;  %v2152_v42 = vld [vmem:[%s2220_s9] ss:$0 sm:$0xff] }
 0x3fd   :  { %v996_v15 = vpop.xlane.xlu2 %995 }
 0x3fe   :  { %v999_v16 = vpop.xlane.xlu0 %998 }
 0x3ff   :  { %v1000_v19 = vadd.f32 %v999_v16, %v996_v15  ;;  %v1628_v20 = vpop.eup %1627 }
 0x400   :  { %v794_v31 = vpop.f32.mrf.mxu1 }
 0x401   :  { %1629 = vrcp.f32 %v1000_v19 }
 0x405   :  { %v1124_v23 = vpop.xlane.xlu1 %1123 }
 0x406   :  { %v745_v24 = vpop.xlane.xlu0 %744 }
 0x407   :  { %v771_v13 = vpop.f32.mrf.mxu3  ;;  %v1127_v25 = vpop.xlane.xlu2 %1126 }
 0x408   :  { %v2074_v26 = vadd.f32 %v794_v31, %v771_v13  ;;  %v923_v18 = vpop.f32.mrf.mxu1  ;;  %v1128_v28 = vadd.f32 %v1127_v25, %v1124_v23  ;;  %v1630_v32 = vpop.eup %1629  ;;  %v1254_v31 = vld [vmem:[%s2221_s10 + $0x8] sm:$0xff] }
 0x40a   :  { %1631 = vrcp.f32 %v1128_v28 }
 0x40f   :  { %v896_v52 = vpop.f32.mrf.mxu3  ;;  %v742_v41 = vpop.xlane.xlu2 %741 }
 0x410   :  { %v924_v50 = vadd.f32 %v923_v18, %v896_v52  ;;  %v1051_v44 = vpop.f32.mrf.mxu1  ;;  %v1632_v29 = vpop.eup %1631  ;;  %v746_v57 = vadd.f32 %v745_v24, %v742_v41 }
 0x412   :  { %v926_v22 = vmul.f32 %v1628_v20, %v924_v50  ;;  %1633 = vrcp.f32 %v746_v57 }
 0x414   :  { %1184 = vrot.lane.b32.xlu1 %v926_v22, %s1711_s2 }
 0x417   :  { %v1025_v27 = vpop.f32.mrf.mxu3 }
 0x418   :  { %v1052_v30 = vadd.f32 %v1051_v44, %v1025_v27  ;;  %v1179_v53 = vpop.f32.mrf.mxu1  ;;  %v1634_v58 = vpop.eup %1633 }
 0x419   :  { %v797_v60 = vmul.f32 %v1634_v58, %v2074_v26 }
 0x41a   :  { %v1054_v33 = vmul.f32 %v1630_v32, %v1052_v30 }
 0x41c   :  { %1188 = vrot.lane.b32.xlu0 %v1054_v33, %s1712_s5  ;;  %s1473_s5 = sshll.u32 %s2227_s16, 4  ;;  %s1474_s5 = int_to_ptr.hbm [resolvable:$true] %s1473_s5 }
 0x420   :  { %v1153_v62 = vpop.f32.mrf.mxu3 }
 0x421   :  { %v1180_v14 = vadd.f32 %v1179_v53, %v1153_v62 }
 0x423   :  { %v1182_v17 = vmul.f32 %v1632_v29, %v1180_v14 }
 0x425   :  { %1192 = vrot.lane.b32.xlu2 %v1182_v17, %s1713_s25  ;;  %v2159_v17 = vld [vmem:[%s2222_s11] ss:$0 sm:$0xff] }
 0x43c   :  { %v664_v46 = vpop.permute.xlu2 %663 }
 0x44c   :  { %v660_v21 = vpop.permute.xlu1 %659 }
 0x44d   :  { %v670_v45 = vsel %vm149_vm6, %v2069_v54, %v660_v21  ;;  %v1266_v54 = vld [vmem:[%s2221_s10 + $0x68] sm:$0xff] }
 0x44e   :  { %v672_v48 = vsel %vm671_vm7, %v670_v45, %v664_v46  ;;  %1275 = vmatpush.msra.mxu0 %v1266_v54  ;;  %1401 = vmatpush.msra.mxu1 %v1266_v54 }
 0x450   :  { %1276 = vmatpush.msra.mxu0 %v1265_v55  ;;  %1402 = vmatpush.msra.mxu1 %v1265_v55 }
 0x452   :  { %1277 = vmatpush.msra.mxu0 %v1264_v3  ;;  %1403 = vmatpush.msra.mxu1 %v1264_v3  ;;  %v1580_v3 = vld [vmem:[%s2223_s12] ss:$0 sm:$0xff] }
 0x454   :  { %1278 = vmatpush.msra.mxu0 %v1263_v4  ;;  %1404 = vmatpush.msra.mxu1 %v1263_v4 }
 0x456   :  { %1279 = vmatpush.msra.mxu0 %v1262_v5  ;;  %1405 = vmatpush.msra.mxu1 %v1262_v5 }
 0x458   :  { %1280 = vmatpush.msra.mxu0 %v1261_v6  ;;  %1406 = vmatpush.msra.mxu1 %v1261_v6  ;;  %v1581_v6 = vld [vmem:[%s2224_s13] ss:$0 sm:$0xff] }
 0x45a   :  { %1281 = vmatpush.msra.mxu0 %v1260_v56  ;;  %1407 = vmatpush.msra.mxu1 %v1260_v56 }
 0x45c   :  { %v668_v47 = vpop.permute.xlu0 %667  ;;  %1282 = vmatpush.msra.mxu0 %v1259_v7  ;;  %1408 = vmatpush.msra.mxu1 %v1259_v7 }
 0x45d   :  { %v674_v49 = vsel %vm673_vm8, %v672_v48, %v668_v47 }
 0x45e   :  { %1551 = vmatmul.msk.f32.vlgmr.msrb.gmra.mxu2 %vm60_vm0, %v674_v49  ;;  %1283 = vmatpush.msra.mxu0 %v1258_v10 }
 0x45f   :  { %1409 = vmatpush.msra.mxu1 %v1258_v10 }
 0x460   :  { %1284 = vmatpush.msra.mxu0 %v1257_v11 }
 0x461   :  { %1410 = vmatpush.msra.mxu1 %v1257_v11 }
 0x462   :  { %1285 = vmatpush.msra.mxu0 %v1256_v9 }
 0x463   :  { %1411 = vmatpush.msra.mxu1 %v1256_v9 }
 0x464   :  { %1286 = vmatpush.msra.mxu0 %v1255_v43 }
 0x465   :  { %1412 = vmatpush.msra.mxu1 %v1255_v43 }
 0x466   :  { %1287 = vmatpush.msra.mxu0 %v1254_v31 }
 0x467   :  { %1413 = vmatpush.msra.mxu1 %v1254_v31 }
 0x468   :  { %1288 = vmatpush.msra.mxu0 %v1253_v12 }
 0x469   :  { %1414 = vmatpush.msra.mxu1 %v1253_v12 }
 0x47f   :  { %v1193_v0 = vpop.permute.xlu2 %1192 }
 0x486   :  { %v1185_v59 = vpop.permute.xlu1 %1184 }
 0x487   :  { %v1195_v61 = vsel %vm149_vm6, %v797_v60, %v1185_v59 }
 0x48e   :  { %v1189_v63 = vpop.permute.xlu0 %1188 }
 0x48f   :  { %v1196_v1 = vsel %vm671_vm7, %v1195_v61, %v1189_v63 }
 0x490   :  { %v1197_v2 = vsel %vm673_vm8, %v1196_v1, %v1193_v0 }
 0x491   :  { %1552 = vmatmul.msk.f32.gmra.mxu2 %vm60_vm0, %v1197_v2 }
 0x4e1   :  { %v1229_v13 = vpop.f32.mrf.mxu2 }
 0x4e2   :  { %v1230_v26 = vadd.f32 %v2152_v42, %v1229_v13 }
 0x4e4   :  { %v1237_v15 = vmul.f32 %v1230_v26, %v1230_v26  ;;  %v1235_v20 = vmul.f32 0.5, %v1230_v26 }
 0x4e6   :  { %v1239_v16 = vmul.f32 %v1237_v15, %v1230_v26 }
 0x4e8   :  { %v1241_v18 = vmul.f32 0.044715, %v1239_v16 }
 0x4ea   :  { %v1243_v19 = vadd.f32 %v1241_v18, %v1230_v26 }
 0x4ec   :  { %v1245_v52 = vmul.f32 0.7978846, %v1243_v19 }
 0x4ee   :  { %1635 = vtanh.f32 %v1245_v52 }
 0x4f4   :  { %v1636_v50 = vpop.eup %1635 }
 0x4f5   :  { %v1249_v22 = vadd.f32 1.0, %v1636_v50 }
 0x4f7   :  { %v1251_v23 = vmul.f32 %v1249_v22, %v1235_v20 }
 0x4f9   :  { %1289 = vmatmul.f32.vlgmr.msra.gmra.mxu0 %v1251_v23 }
 0x514   :  { %v1232_v25 = vpop.f32.mrf.mxu2 }
 0x515   :  { %v1233_v44 = vadd.f32 %v2152_v42, %v1232_v25 }
 0x517   :  { %v1238_v27 = vmul.f32 %v1233_v44, %v1233_v44  ;;  %v1236_v62 = vmul.f32 0.5, %v1233_v44 }
 0x519   :  { %v1240_v28 = vmul.f32 %v1238_v27, %v1233_v44 }
 0x51b   :  { %v1242_v30 = vmul.f32 0.044715, %v1240_v28 }
 0x51d   :  { %v1244_v32 = vadd.f32 %v1242_v30, %v1233_v44 }
 0x51f   :  { %v1246_v33 = vmul.f32 0.7978846, %v1244_v32 }
 0x521   :  { %1637 = vtanh.f32 %v1246_v33  ;;  %v1427_v33 = vld [vmem:[%s2225_s14 + $0x18] sm:$0xff] }
 0x522   :  { %1450 = vmatpush.msra.mxu2 %v1427_v33 }
 0x527   :  { %v1638_v53 = vpop.eup %1637 }
 0x528   :  { %v1250_v14 = vadd.f32 1.0, %v1638_v53 }
 0x52a   :  { %v1252_v29 = vmul.f32 %v1250_v14, %v1236_v62 }
 0x52c   :  { %1292 = vmatmul.f32.gmra.mxu0 %v1252_v29 }
 0x576   :  { %v1290_v34 = vpop.f32.mrf.mxu0 }
 0x577   :  { %v1291_v36 = vadd.f32 %v2159_v17, %v1290_v34 }
 0x579   :  { %v1298_v39 = vsel %vm60_vm0, %v1291_v36, 0.0 }
 0x57a   :  { %1299 = vadd.xlane.f32.xlu1 %v1298_v39 }
 0x5a9   :  { %v1293_v40 = vpop.f32.mrf.mxu0 }
 0x5aa   :  { %v1294_v41 = vadd.f32 %v2159_v17, %v1293_v40 }
 0x5ac   :  { %v1301_v24 = vsel %vm60_vm0, %v1294_v41, 0.0 }
 0x5ad   :  { %1302 = vadd.xlane.f32.xlu0 %v1301_v24 }
 0x5ed   :  { %v1300_v21 = vpop.xlane.xlu1 %1299 }
 0x5ee   :  { %v1304_v45 = vmul.f32 %v1300_v21, %v1811_v8 }
 0x5f0   :  { %v1306_v46 = vsub.f32 %v1291_v36, %v1304_v45  ;;  %v1426_v45 = vld [vmem:[%s2225_s14 + $0x10] sm:$0xff] }
 0x5f1   :  { %1451 = vmatpush.msra.mxu2 %v1426_v45 }
 0x5f2   :  { %v1308_v47 = vmul.f32 %v1306_v46, %v1306_v46 }
 0x5f4   :  { %v1310_v48 = vsel %vm60_vm0, %v1308_v47, 0.0 }
 0x5f5   :  { %1311 = vadd.xlane.f32.xlu2 %v1310_v48 }
 0x620   :  { %v1303_v49 = vpop.xlane.xlu0 %1302 }
 0x621   :  { %v1305_v51 = vmul.f32 %v1303_v49, %v1811_v8 }
 0x623   :  { %v1307_v38 = vsub.f32 %v1294_v41, %v1305_v51 }
 0x625   :  { %v1309_v54 = vmul.f32 %v1307_v38, %v1307_v38 }
 0x627   :  { %v1313_v55 = vsel %vm60_vm0, %v1309_v54, 0.0 }
 0x628   :  { %1314 = vadd.xlane.f32.xlu1 %v1313_v55 }
 0x668   :  { %v1312_v57 = vpop.xlane.xlu2 %1311 }
 0x669   :  { %v1316_v58 = vmul.f32 %v1312_v57, %v1811_v8 }
 0x66b   :  { %v1318_v59 = vadd.f32 1e-05, %v1316_v58 }
 0x66d   :  { %1639 = vrsqrt.f32 %v1318_v59  ;;  %vm1326_vm10 = vweird.f32 %v1318_v59 }
 0x673   :  { %v1640_v60 = vpop.eup %1639 }
 0x674   :  { %v1321_v61 = vmul.f32 %v1640_v60, %v1318_v59  ;;  %vm1327_vm9 = vweird.f32 %v1640_v60 }
 0x675   :  { %vm1328_vm11 = vmor %vm1326_vm10, %vm1327_vm9 }
 0x676   :  { %v1322_v63 = vmul.f32 %v1640_v60, %v1321_v61 }
 0x678   :  { %v1323_v0 = vmul.f32 0.5, %v1322_v63 }
 0x67a   :  { %v1324_v1 = vsub.f32 1.5, %v1323_v0 }
 0x67c   :  { %v1325_v2 = vmul.f32 %v1640_v60, %v1324_v1 }
 0x67e   :  { %v1329_v4 = vsel %vm1328_vm11, %v1640_v60, %v1325_v2 }
 0x67f   :  { %v1340_v5 = vmul.f32 %v1329_v4, %v1306_v46  ;;  %v1425_v46 = vld [vmem:[%s2225_s14 + $0x8] sm:$0xff] }
 0x680   :  { %1452 = vmatpush.msra.mxu2 %v1425_v46 }
 0x681   :  { %v1345_v56 = vmul.f32 %v1580_v3, %v1340_v5 }
 0x683   :  { %v1350_v7 = vadd.f32 %v1581_v6, %v1345_v56 }
 0x685   :  { %1553 = vmatmul.msk.f32.vlgmr.msra.gmra.mxu3 %vm60_vm0, %v1350_v7 }
 0x69b   :  { %v1315_v10 = vpop.xlane.xlu1 %1314 }
 0x69c   :  { %v1317_v11 = vmul.f32 %v1315_v10, %v1811_v8 }
 0x69e   :  { %v1319_v9 = vadd.f32 1e-05, %v1317_v11 }
 0x6a0   :  { %1641 = vrsqrt.f32 %v1319_v9  ;;  %vm1336_vm13 = vweird.f32 %v1319_v9 }
 0x6a6   :  { %v1642_v43 = vpop.eup %1641 }
 0x6a7   :  { %v1331_v31 = vmul.f32 %v1642_v43, %v1319_v9  ;;  %vm1337_vm12 = vweird.f32 %v1642_v43 }
 0x6a8   :  { %vm1338_vm14 = vmor %vm1336_vm13, %vm1337_vm12 }
 0x6a9   :  { %v1332_v12 = vmul.f32 %v1642_v43, %v1331_v31 }
 0x6ab   :  { %v1333_v13 = vmul.f32 0.5, %v1332_v12 }
 0x6ad   :  { %v1334_v26 = vsub.f32 1.5, %v1333_v13 }
 0x6af   :  { %v1335_v15 = vmul.f32 %v1642_v43, %v1334_v26 }
 0x6b1   :  { %v1339_v16 = vsel %vm1338_vm14, %v1642_v43, %v1335_v15 }
 0x6b2   :  { %v1341_v18 = vmul.f32 %v1339_v16, %v1307_v38 }
 0x6b4   :  { %v1346_v19 = vmul.f32 %v1580_v3, %v1341_v18 }
 0x6b6   :  { %v1351_v52 = vadd.f32 %v1581_v6, %v1346_v19 }
 0x6b8   :  { %1554 = vmatmul.msk.f32.gmra.mxu3 %vm60_vm0, %v1351_v52 }
 0x708   :  { %v1375_v50 = vpop.f32.mrf.mxu3 }
 0x709   :  { %v1376_v8 = vadd.f32 %v2152_v42, %v1375_v50 }
 0x70b   :  { %v1383_v20 = vmul.f32 %v1376_v8, %v1376_v8  ;;  %v1381_v28 = vmul.f32 0.5, %v1376_v8 }
 0x70d   :  { %v1385_v22 = vmul.f32 %v1383_v20, %v1376_v8 }
 0x70f   :  { %v1387_v23 = vmul.f32 0.044715, %v1385_v22 }
 0x711   :  { %v1389_v25 = vadd.f32 %v1387_v23, %v1376_v8 }
 0x713   :  { %v1391_v44 = vmul.f32 0.7978846, %v1389_v25 }
 0x715   :  { %1643 = vtanh.f32 %v1391_v44 }
 0x71b   :  { %v1644_v27 = vpop.eup %1643 }
 0x71c   :  { %v1395_v30 = vadd.f32 1.0, %v1644_v27 }
 0x71e   :  { %v1397_v32 = vmul.f32 %v1395_v30, %v1381_v28 }
 0x720   :  { %1415 = vmatmul.f32.vlgmr.msra.gmra.mxu1 %v1397_v32 }
 0x73b   :  { %v1378_v53 = vpop.f32.mrf.mxu3 }
 0x73c   :  { %v1379_v62 = vadd.f32 %v2152_v42, %v1378_v53  ;;  %v1424_v42 = vld [vmem:[%s2225_s14] sm:$0xff]  ;;  %s1714_s14 = smov [#allocation4]  }
 0x73d   :  { %1453 = vmatpush.msra.mxu2 %v1424_v42  ;;  %s1485_s8 = sshll.u32 %s1714_s14, 4  ;;  %s1486_s8 = int_to_ptr.vmem [resolvable:$true] %s1485_s8 }
 0x73e   :  { %v1384_v14 = vmul.f32 %v1379_v62, %v1379_v62  ;;  %v1382_v41 = vmul.f32 0.5, %v1379_v62 }
 0x740   :  { %v1386_v29 = vmul.f32 %v1384_v14, %v1379_v62 }
 0x742   :  { %v1388_v34 = vmul.f32 0.044715, %v1386_v29 }
 0x744   :  { %v1390_v36 = vadd.f32 %v1388_v34, %v1379_v62 }
 0x746   :  { %v1392_v39 = vmul.f32 0.7978846, %v1390_v36 }
 0x748   :  { %1645 = vtanh.f32 %v1392_v39 }
 0x74e   :  { %v1646_v40 = vpop.eup %1645 }
 0x74f   :  { %v1396_v24 = vadd.f32 1.0, %v1646_v40 }
 0x751   :  { %v1398_v21 = vmul.f32 %v1396_v24, %v1382_v41 }
 0x753   :  { %1418 = vmatmul.f32.gmra.mxu1 %v1398_v21 }
 0x79d   :  { %v1416_v47 = vpop.f32.mrf.mxu1 }
 0x79e   :  { %v1417_v48 = vadd.f32 %v2159_v17, %v1416_v47 }
 0x7a0   :  { %v1422_v49 = vadd.f32 %v1417_v48, %v1838_v35  ;;  %v1582_v35 = vld [vmem:[%s2226_s15] ss:$0 sm:$0xff] }
 0x7a2   :  { %1555 = vmatmul.msk.f32.vlgmr.msra.gmra.mxu2 %vm60_vm0, %v1422_v49 }
 0x7d0   :  { %v1419_v51 = vpop.f32.mrf.mxu1 }
 0x7d1   :  { %v1420_v38 = vadd.f32 %v2159_v17, %v1419_v51 }
 0x7d3   :  { %v1423_v54 = vadd.f32 %v1420_v38, %v1843_v37 }
 0x7d5   :  { %v1463_v55 = vrot.slane %v1423_v54, 4  ;;  %1556 = vmatmul.msk.f32.gmra.mxu2 %vm60_vm0, %v1423_v54 }
 0x7d7   :  { %v1465_v57 = vsel %vm105_vm5, %v1422_v49, %v1463_v55 }
 0x7d8   :  { %1466 = vst.msk [vmem:[#allocation4] sm:$0xff] %vm60_vm0, %v1465_v57 }
 0x7d9   :  { %1490 = dma.vmem_to_hbm [thread:$0]  %s1486_s8, 128, %s1488_s21, [#allocation5]  }
 0x825   :  { %v1455_v37 = vpop.f32.mrf.mxu2 }
 0x826   :  { %v1456_v17 = vadd.f32 %v1582_v35, %v1455_v37 }
 0x828   :  { %1461 = vst [vmem:[#allocation2] sm:$0xff] %v1456_v17 }
 0x858   :  { %v1458_v58 = vpop.f32.mrf.mxu2 }
 0x859   :  { %v1459_v59 = vadd.f32 %v1582_v35, %v1458_v58 }
 0x85b   :  { %1462 = vst [vmem:[#allocation2 + $0x8] sm:$0xff] %v1459_v59 }
 0x85c   :  { %1479 = dma.vmem_to_hbm [thread:$0]  %s1472_s24, 256, %s1474_s5, [#allocation3], %s1716_s17, %s1716_s17, %s1711_s2  }
 0x85d   :  { %1695 = dma.done.wait [#allocation3], 256  }
 0x85e   :  { %1696 = vsyncadd [#allocation3], 4294967040 }
 0x85f   :  { %1697 = dma.done.wait [#allocation5], 128  }
 0x860   :  { %1698 = vsyncadd [#allocation5], 4294967168 }
 0x861   :  { %1499 = vsyncpa [#allocation3], 1 }
 0x862   :  { %1500 = vsyncpa [#allocation5], 1 }

</bundles_post_ra>
